<compile_context>
chip_gen: v7x
topology: tpu7x:2x2x1
jax: 0.10.0
libtpu: 0.0.40
codegen_flags: <defaults>
</compile_context>

<pallas_src>
import math

import jax
import jax.numpy as jnp
from jax import lax
from jax.experimental import pallas as pl
from jax.experimental.pallas import tpu as pltpu

EXPANSION = 4
_LANE = 128


def _round_up(x, m):
    return ((x + m - 1) // m) * m


def _bn_affine(gamma, beta, mean, var, eps):
    scale = gamma / jnp.sqrt(var + eps)
    shift = beta - mean * scale
    return (scale.reshape(1, -1).astype(jnp.float32),
            shift.reshape(1, -1).astype(jnp.float32))


def _make_kernel(bt, H, W, cin, planes, cpad, stride, has_shortcut, mdt):
    Ho = (H - 1) // stride + 1
    Wo = (W - 1) // stride + 1
    n_rows = bt * H * W
    n_out_rows = bt * Ho * Wo

    def kernel(s1_ref, b1_ref, s2_ref, b2_ref, s3_ref, b3_ref,
               w1_ref, w2_ref, w3_ref, *rest):
        if has_shortcut:
            wsc_ref, x_ref, out_ref, pad0, pad1, pad2, acc_ref = rest
        else:
            x_ref, out_ref, pad0, pad1, pad2, acc_ref = rest

        # ---- bn1 (folded per-channel affine, f32) + relu --------------------
        xf = x_ref[...].reshape(n_rows, cin)
        a1 = jnp.maximum(xf.astype(jnp.float32) * s1_ref[...] + b1_ref[...], 0.0)
        a1_m = a1.astype(mdt)

        # ---- shortcut branch ------------------------------------------------
        if has_shortcut:
            if stride == 1:
                sc_in = a1_m
            else:
                # ref-level strided read; recompute bn1+relu on the subsample.
                xs = x_ref[:, pl.ds(0, Ho, stride=stride),
                           pl.ds(0, Wo, stride=stride), :]
                xs = xs.reshape(n_out_rows, cin).astype(jnp.float32)
                sc_in = jnp.maximum(xs * s1_ref[...] + b1_ref[...], 0.0).astype(mdt)
            shortcut = jnp.dot(sc_in, wsc_ref[...],
                               preferred_element_type=jnp.float32)
        else:
            # identity shortcut (stride == 1, cin == cout).  Note: in bf16 mode
            # the identity path uses the bf16-rounded input.
            shortcut = xf.astype(jnp.float32)
            if cpad != cin:
                shortcut = jnp.concatenate(
                    [shortcut, jnp.zeros((n_rows, cpad - cin), jnp.float32)],
                    axis=1)

        # ---- conv1 (1x1) -> bn2 -> relu -------------------------------------
        h1 = jnp.dot(a1_m, w1_ref[...], preferred_element_type=jnp.float32)
        a2 = jnp.maximum(h1 * s2_ref[...] + b2_ref[...], 0.0)
        a2_m = a2.astype(mdt).reshape(bt, H, W, planes)

        # ---- build the three W-shift slots for the 3x3 conv -----------------
        # slot dx holds  S_dx[b, h, w, :] = a2_zero-padded[b, h, w + dx, :]
        # so every tap read below is an aligned slice along H only.
        zero_row = jnp.zeros((bt, 1, W, planes), mdt)
        zero_col = jnp.zeros((bt, H, 1, planes), mdt)
        for p in (pad0, pad1, pad2):
            p[:, 0:1, :, :] = zero_row
            p[:, H + 1:H + 2, :, :] = zero_row
        pad1[:, 1:H + 1, :, :] = a2_m
        pad0[:, 1:H + 1, 1:, :] = a2_m[:, :, :W - 1, :]
        pad0[:, 1:H + 1, 0:1, :] = zero_col
        pad2[:, 1:H + 1, :W - 1, :] = a2_m[:, :, 1:, :]
        pad2[:, 1:H + 1, W - 1:, :] = zero_col

        # ---- conv2 (3x3, stride) as 9 MXU matmuls into a VMEM f32 acc -------
        pads = (pad0, pad1, pad2)
        first = True
        for dy in range(3):
            for dx in range(3):
                src = pads[dx]
                if stride == 1:
                    patch = src[:, dy:dy + Ho, :, :]
                else:
                    patch = src[:, pl.ds(dy, Ho, stride=stride),
                                pl.ds(0, Wo, stride=stride), :]
                contrib = jnp.dot(patch.reshape(n_out_rows, planes),
                                  w2_ref[3 * dy + dx],
                                  preferred_element_type=jnp.float32)
                if first:
                    acc_ref[...] = contrib
                    first = False
                else:
                    acc_ref[...] += contrib

        # ---- bn3 -> relu -> conv3 (1x1) -> residual add ----------------------
        a3 = jnp.maximum(acc_ref[...] * s3_ref[...] + b3_ref[...], 0.0)
        out = jnp.dot(a3.astype(mdt), w3_ref[...],
                      preferred_element_type=jnp.float32)
        out = out + shortcut
        out_ref[...] = out.reshape(bt, Ho, Wo, cpad)

    return kernel


def _vmem_bytes(bt, H, W, Ho, Wo, cin, planes, cpad, mdt_bytes):
    """Rough per-grid-step VMEM footprint (double-buffered I/O + scratch)."""
    inp = bt * H * W * cin * mdt_bytes
    outp = bt * Ho * Wo * cpad * 4
    wts = (cin * planes + 9 * planes * planes
           + planes * cpad + cin * cpad) * mdt_bytes
    pads = 3 * bt * (H + 2) * W * planes * mdt_bytes
    acc = bt * Ho * Wo * planes * 4
    live = bt * H * W * (cin + 2 * planes) * 4 + 2 * bt * Ho * Wo * cpad * 4
    return 2 * (inp + outp + wts) + pads + acc + live


def _pick_bt(B, fits):
    divisors = [d for d in range(1, B + 1) if B % d == 0]
    # keep >= 2 grid programs when possible so a 2-TC part (v7x megacore)
    # can shard the "parallel" batch axis across both cores.
    preferred = [d for d in divisors if d <= max(1, B // 2)] or divisors
    best = 1
    for d in preferred:          # ascending; keep the largest that fits
        if fits(d):
            best = d
    return best


def preact_bottleneck(x, params, *, stride=1, eps=1e-5, bt=None,
                      mxu_dtype=jnp.bfloat16, data_format="NCHW",
                      vmem_budget_bytes=40 * (1 << 20)):
    """PreActBottleneck forward (eval-mode BN).

    x: (B, Cin, H, W) if data_format == "NCHW", else (B, H, W, Cin).
    params: PyTorch-layout tensors:
        bn{1,2,3}: (gamma, beta, running_mean, running_var)
        conv1_w (planes, Cin, 1, 1), conv2_w (planes, planes, 3, 3),
        conv3_w (4*planes, planes, 1, 1), optional shortcut_w (4*planes, Cin, 1, 1)
    """
    if data_format == "NCHW":
        x = jnp.transpose(x, (0, 2, 3, 1))
    B, H, W, cin = x.shape
    assert W >= 2, "kernel requires W >= 2"

    planes = params['conv1_w'].shape[0]
    cout = EXPANSION * planes
    has_shortcut = (stride != 1) or (cin != cout)
    if has_shortcut:
        assert 'shortcut_w' in params, "shortcut conv weight required"

    Ho = (H - 1) // stride + 1
    Wo = (W - 1) // stride + 1
    cpad = _round_up(cout, _LANE)          # lane-dense output stores
    mdt = mxu_dtype
    mdt_bytes = jnp.dtype(mdt).itemsize

    # Fold eval-mode BatchNorm into per-channel (scale, shift) in f32.
    s1, b1 = _bn_affine(*params['bn1'], eps)
    s2, b2 = _bn_affine(*params['bn2'], eps)
    s3, b3 = _bn_affine(*params['bn3'], eps)

    # Conv weights -> matmul layout in the MXU dtype (bf16 by default).
    w1 = params['conv1_w'][:, :, 0, 0].T.astype(mdt)                   # (cin, planes)
    w2 = jnp.transpose(params['conv2_w'], (2, 3, 1, 0))                # (3,3,in,out)
    w2 = w2.reshape(9, planes, planes).astype(mdt)
    w3 = params['conv3_w'][:, :, 0, 0].T.astype(jnp.float32)           # (planes, cout)
    if cpad != cout:
        w3 = jnp.pad(w3, ((0, 0), (0, cpad - cout)))
    w3 = w3.astype(mdt)

    inputs = [s1, b1, s2, b2, s3, b3, w1, w2, w3]
    if has_shortcut:
        wsc = params['shortcut_w'][:, :, 0, 0].T.astype(jnp.float32)   # (cin, cout)
        if cpad != cout:
            wsc = jnp.pad(wsc, ((0, 0), (0, cpad - cout)))
        inputs.append(wsc.astype(mdt))
    inputs.append(x.astype(mdt))

    if bt is None:
        bt = _pick_bt(B, lambda d: _vmem_bytes(d, H, W, Ho, Wo, cin, planes,
                                               cpad, mdt_bytes)
                      <= vmem_budget_bytes)
    assert B % bt == 0

    est = _vmem_bytes(bt, H, W, Ho, Wo, cin, planes, cpad, mdt_bytes)
    vmem_limit = int(min(max(int(est * 1.5), 32 << 20), 64 << 20))

    def full_spec(arr):
        nd = arr.ndim
        return pl.BlockSpec(arr.shape, lambda b, nd=nd: (0,) * nd)

    in_specs = [full_spec(a) for a in inputs[:-1]]
    in_specs.append(pl.BlockSpec((bt, H, W, cin), lambda b: (b, 0, 0, 0)))

    kernel = _make_kernel(bt, H, W, cin, planes, cpad, stride, has_shortcut, mdt)

    out = pl.pallas_call(
        kernel,
        out_shape=jax.ShapeDtypeStruct((B, Ho, Wo, cpad), jnp.float32),
        grid_spec=pltpu.PrefetchScalarGridSpec(
            num_scalar_prefetch=0,
            grid=(B // bt,),
            in_specs=in_specs,
            out_specs=pl.BlockSpec((bt, Ho, Wo, cpad), lambda b: (b, 0, 0, 0)),
            scratch_shapes=(
                [pltpu.VMEM((bt, H + 2, W, planes), mdt) for _ in range(3)]
                + [pltpu.VMEM((bt * Ho * Wo, planes), jnp.float32)]),
        ),
        compiler_params=pltpu.CompilerParams(
            dimension_semantics=("parallel",),
            vmem_limit_bytes=vmem_limit),
    )(*inputs)

    if cpad != cout:
        out = out[..., :cout]
    if data_format == "NCHW":
        out = jnp.transpose(out, (0, 3, 1, 2))
    return out


def _reference(x, params, stride, eps):
    def bn(h, p):
        gamma, beta, mean, var = p
        inv = 1.0 / jnp.sqrt(var + eps)
        return ((h - mean[None, :, None, None]) * (gamma * inv)[None, :, None, None]
                + beta[None, :, None, None])

    dn = ('NCHW', 'OIHW', 'NCHW')
    out = jax.nn.relu(bn(x, params['bn1']))
    if 'shortcut_w' in params:
        shortcut = lax.conv_general_dilated(out, params['shortcut_w'],
                                            (stride, stride), 'VALID',
                                            dimension_numbers=dn)
    else:
        shortcut = x
    h = lax.conv_general_dilated(out, params['conv1_w'], (1, 1), 'VALID',
                                 dimension_numbers=dn)
    h = jax.nn.relu(bn(h, params['bn2']))
    h = lax.conv_general_dilated(h, params['conv2_w'], (stride, stride),
                                 ((1, 1), (1, 1)), dimension_numbers=dn)
    h = jax.nn.relu(bn(h, params['bn3']))
    h = lax.conv_general_dilated(h, params['conv3_w'], (1, 1), 'VALID',
                                 dimension_numbers=dn)
    return h + shortcut


if __name__ == "__main__":
    B, in_planes, planes = 2, 16, 8
    H = W = 8
    stride = 1
    cout = EXPANSION * planes
    eps = 1e-5

    key = jax.random.PRNGKey(0)
    ks = jax.random.split(key, 8)

    def conv_init(k, shape):
        fan_in = shape[1] * shape[2] * shape[3]
        bound = math.sqrt(2.0) * math.sqrt(3.0 / fan_in)
        return jax.random.uniform(k, shape, jnp.float32, -bound, bound)

    def bn_init(k, c):
        k1, k2, k3, k4 = jax.random.split(k, 4)
        gamma = jax.random.uniform(k1, (c,), jnp.float32, 0.5, 1.5)
        beta = 0.1 * jax.random.normal(k2, (c,), jnp.float32)
        mean = 0.1 * jax.random.normal(k3, (c,), jnp.float32)
        var = jax.random.uniform(k4, (c,), jnp.float32, 0.5, 1.5)
        return (gamma, beta, mean, var)

    params = {
        'bn1': bn_init(ks[0], in_planes),
        'conv1_w': conv_init(ks[1], (planes, in_planes, 1, 1)),
        'bn2': bn_init(ks[2], planes),
        'conv2_w': conv_init(ks[3], (planes, planes, 3, 3)),
        'bn3': bn_init(ks[4], planes),
        'conv3_w': conv_init(ks[5], (cout, planes, 1, 1)),
    }
    if stride != 1 or in_planes != cout:
        params['shortcut_w'] = conv_init(ks[6], (cout, in_planes, 1, 1))

    x = jax.random.normal(ks[7], (B, in_planes, H, W), jnp.float32)

    ref = _reference(x, params, stride, eps)

    # Tight structural check with the f32 MXU path.
    out_f32 = preact_bottleneck(x, params, stride=stride, eps=eps,
                                mxu_dtype=jnp.float32)
    out_f32 = jax.block_until_ready(out_f32)
    assert out_f32.shape == ref.shape == (B, cout, H, W)
    err_f32 = float(jnp.max(jnp.abs(out_f32 - ref)))
    assert jnp.allclose(out_f32, ref, atol=2e-4, rtol=2e-4), err_f32

    # Default bf16 MXU datapath (production config); bf16-appropriate tolerance.
    out_bf16 = preact_bottleneck(x, params, stride=stride, eps=eps)
    out_bf16 = jax.block_until_ready(out_bf16)
    assert out_bf16.shape == ref.shape
    err_bf16 = float(jnp.max(jnp.abs(out_bf16 - ref)))
    assert jnp.allclose(out_bf16, ref, atol=0.25, rtol=0.05), err_bf16

    print("KERNEL_OK")
</pallas_src>

<mosaic_0001>
module attributes {stable_mosaic.version = 11 : i64} {
  func.func @kernel(%arg0: i32, %arg1: memref<1x16xf32, #tpu.memory_space<vmem>>, %arg2: memref<1x16xf32, #tpu.memory_space<vmem>>, %arg3: memref<1x8xf32, #tpu.memory_space<vmem>>, %arg4: memref<1x8xf32, #tpu.memory_space<vmem>>, %arg5: memref<1x8xf32, #tpu.memory_space<vmem>>, %arg6: memref<1x8xf32, #tpu.memory_space<vmem>>, %arg7: memref<16x8xf32, #tpu.memory_space<vmem>>, %arg8: memref<9x8x8xf32, #tpu.memory_space<vmem>>, %arg9: memref<8x128xf32, #tpu.memory_space<vmem>>, %arg10: memref<16x128xf32, #tpu.memory_space<vmem>>, %arg11: memref<1x8x8x16xf32, #tpu.memory_space<vmem>>, %arg12: memref<1x8x8x128xf32, #tpu.memory_space<vmem>>, %arg13: memref<1x10x8x8xf32, #tpu.memory_space<vmem>>, %arg14: memref<1x10x8x8xf32, #tpu.memory_space<vmem>>, %arg15: memref<1x10x8x8xf32, #tpu.memory_space<vmem>>, %arg16: memref<64x8xf32, #tpu.memory_space<vmem>>) attributes {dimension_semantics = [#tpu.dimension_semantics<parallel>], iteration_bounds = array<i64: 2>, scalar_prefetch = 0 : i64, scratch_operands = 4 : i64, tpu.core_type = #tpu.core_type<tc>, window_params = [{pipeline_mode = #tpu.pipeline_mode<synchronous>, transform_indices = @transform_0, window_bounds = array<i64: 1, 16>}, {pipeline_mode = #tpu.pipeline_mode<synchronous>, transform_indices = @transform_1, window_bounds = array<i64: 1, 16>}, {pipeline_mode = #tpu.pipeline_mode<synchronous>, transform_indices = @transform_2, window_bounds = array<i64: 1, 8>}, {pipeline_mode = #tpu.pipeline_mode<synchronous>, transform_indices = @transform_3, window_bounds = array<i64: 1, 8>}, {pipeline_mode = #tpu.pipeline_mode<synchronous>, transform_indices = @transform_4, window_bounds = array<i64: 1, 8>}, {pipeline_mode = #tpu.pipeline_mode<synchronous>, transform_indices = @transform_5, window_bounds = array<i64: 1, 8>}, {pipeline_mode = #tpu.pipeline_mode<synchronous>, transform_indices = @transform_6, window_bounds = array<i64: 16, 8>}, {pipeline_mode = #tpu.pipeline_mode<synchronous>, transform_indices = @transform_7, window_bounds = array<i64: 9, 8, 8>}, {pipeline_mode = #tpu.pipeline_mode<synchronous>, transform_indices = @transform_8, window_bounds = array<i64: 8, 128>}, {pipeline_mode = #tpu.pipeline_mode<synchronous>, transform_indices = @transform_9, window_bounds = array<i64: 16, 128>}, {transform_indices = @transform_10, window_bounds = array<i64: 1, 8, 8, 16>}, {transform_indices = @transform_11, window_bounds = array<i64: 1, 8, 8, 128>}]} {
    %c0 = arith.constant 0 : index
    %c0_0 = arith.constant 0 : index
    %c0_1 = arith.constant 0 : index
    %c0_2 = arith.constant 0 : index
    %0 = vector.load %arg11[%c0, %c0_0, %c0_1, %c0_2] : memref<1x8x8x16xf32, #tpu.memory_space<vmem>>, vector<1x8x8x16xf32>
    %1 = vector.shape_cast %0 : vector<1x8x8x16xf32> to vector<64x16xf32>
    %c0_3 = arith.constant 0 : index
    %c0_4 = arith.constant 0 : index
    %2 = vector.load %arg1[%c0_3, %c0_4] : memref<1x16xf32, #tpu.memory_space<vmem>>, vector<1x16xf32>
    %3 = vector.broadcast %2 : vector<1x16xf32> to vector<64x16xf32>
    %4 = arith.mulf %1, %3 : vector<64x16xf32>
    %c0_5 = arith.constant 0 : index
    %c0_6 = arith.constant 0 : index
    %5 = vector.load %arg2[%c0_5, %c0_6] : memref<1x16xf32, #tpu.memory_space<vmem>>, vector<1x16xf32>
    %6 = vector.broadcast %5 : vector<1x16xf32> to vector<64x16xf32>
    %7 = arith.addf %4, %6 : vector<64x16xf32>
    %cst = arith.constant 0.000000e+00 : f32
    %8 = vector.broadcast %cst : f32 to vector<64x16xf32>
    %9 = arith.maximumf %7, %8 : vector<64x16xf32>
    %c0_7 = arith.constant 0 : index
    %c0_8 = arith.constant 0 : index
    %10 = vector.load %arg10[%c0_7, %c0_8] : memref<16x128xf32, #tpu.memory_space<vmem>>, vector<16x128xf32>
    %cst_9 = arith.constant dense<0.000000e+00> : vector<64x128xf32>
    %11 = tpu.matmul %9, %10, %cst_9 {dimension_numbers = #tpu.dot_dimension_numbers<[1], [0], [0], [1], [0, 0, 1, 1], [], []>} : vector<64x16xf32>, vector<16x128xf32>, vector<64x128xf32> -> vector<64x128xf32>
    %c0_10 = arith.constant 0 : index
    %c0_11 = arith.constant 0 : index
    %12 = vector.load %arg7[%c0_10, %c0_11] : memref<16x8xf32, #tpu.memory_space<vmem>>, vector<16x8xf32>
    %cst_12 = arith.constant dense<0.000000e+00> : vector<64x8xf32>
    %13 = tpu.matmul %9, %12, %cst_12 {dimension_numbers = #tpu.dot_dimension_numbers<[1], [0], [0], [1], [0, 0, 1, 1], [], []>} : vector<64x16xf32>, vector<16x8xf32>, vector<64x8xf32> -> vector<64x8xf32>
    %c0_13 = arith.constant 0 : index
    %c0_14 = arith.constant 0 : index
    %14 = vector.load %arg3[%c0_13, %c0_14] : memref<1x8xf32, #tpu.memory_space<vmem>>, vector<1x8xf32>
    %15 = vector.broadcast %14 : vector<1x8xf32> to vector<64x8xf32>
    %16 = arith.mulf %13, %15 : vector<64x8xf32>
    %c0_15 = arith.constant 0 : index
    %c0_16 = arith.constant 0 : index
    %17 = vector.load %arg4[%c0_15, %c0_16] : memref<1x8xf32, #tpu.memory_space<vmem>>, vector<1x8xf32>
    %18 = vector.broadcast %17 : vector<1x8xf32> to vector<64x8xf32>
    %19 = arith.addf %16, %18 : vector<64x8xf32>
    %cst_17 = arith.constant 0.000000e+00 : f32
    %20 = vector.broadcast %cst_17 : f32 to vector<64x8xf32>
    %21 = arith.maximumf %19, %20 : vector<64x8xf32>
    %22 = vector.shape_cast %21 : vector<64x8xf32> to vector<1x8x8x8xf32>
    %cst_18 = arith.constant 0.000000e+00 : f32
    %23 = vector.broadcast %cst_18 : f32 to vector<1x1x8x8xf32>
    %cst_19 = arith.constant 0.000000e+00 : f32
    %24 = vector.broadcast %cst_19 : f32 to vector<1x8x1x8xf32>
    %c0_20 = arith.constant 0 : index
    %c0_21 = arith.constant 0 : index
    %c0_22 = arith.constant 0 : index
    %c0_23 = arith.constant 0 : index
    %25 = vector.load %arg13[%c0_20, %c0_21, %c0_22, %c0_23] : memref<1x10x8x8xf32, #tpu.memory_space<vmem>>, vector<1x1x8x8xf32>
    tpu.vector_store %arg13[%c0_20, %c0_21, %c0_22, %c0_23], %23 {strides = array<i32>} : memref<1x10x8x8xf32, #tpu.memory_space<vmem>>, vector<1x1x8x8xf32>,
    %c0_24 = arith.constant 0 : index
    %c9 = arith.constant 9 : index
    %c0_25 = arith.constant 0 : index
    %c0_26 = arith.constant 0 : index
    %26 = vector.load %arg13[%c0_24, %c9, %c0_25, %c0_26] : memref<1x10x8x8xf32, #tpu.memory_space<vmem>>, vector<1x1x8x8xf32>
    tpu.vector_store %arg13[%c0_24, %c9, %c0_25, %c0_26], %23 {strides = array<i32>} : memref<1x10x8x8xf32, #tpu.memory_space<vmem>>, vector<1x1x8x8xf32>,
    %c0_27 = arith.constant 0 : index
    %c0_28 = arith.constant 0 : index
    %c0_29 = arith.constant 0 : index
    %c0_30 = arith.constant 0 : index
    %27 = vector.load %arg14[%c0_27, %c0_28, %c0_29, %c0_30] : memref<1x10x8x8xf32, #tpu.memory_space<vmem>>, vector<1x1x8x8xf32>
    tpu.vector_store %arg14[%c0_27, %c0_28, %c0_29, %c0_30], %23 {strides = array<i32>} : memref<1x10x8x8xf32, #tpu.memory_space<vmem>>, vector<1x1x8x8xf32>,
    %c0_31 = arith.constant 0 : index
    %c9_32 = arith.constant 9 : index
    %c0_33 = arith.constant 0 : index
    %c0_34 = arith.constant 0 : index
    %28 = vector.load %arg14[%c0_31, %c9_32, %c0_33, %c0_34] : memref<1x10x8x8xf32, #tpu.memory_space<vmem>>, vector<1x1x8x8xf32>
    tpu.vector_store %arg14[%c0_31, %c9_32, %c0_33, %c0_34], %23 {strides = array<i32>} : memref<1x10x8x8xf32, #tpu.memory_space<vmem>>, vector<1x1x8x8xf32>,
    %c0_35 = arith.constant 0 : index
    %c0_36 = arith.constant 0 : index
    %c0_37 = arith.constant 0 : index
    %c0_38 = arith.constant 0 : index
    %29 = vector.load %arg15[%c0_35, %c0_36, %c0_37, %c0_38] : memref<1x10x8x8xf32, #tpu.memory_space<vmem>>, vector<1x1x8x8xf32>
    tpu.vector_store %arg15[%c0_35, %c0_36, %c0_37, %c0_38], %23 {strides = array<i32>} : memref<1x10x8x8xf32, #tpu.memory_space<vmem>>, vector<1x1x8x8xf32>,
    %c0_39 = arith.constant 0 : index
    %c9_40 = arith.constant 9 : index
    %c0_41 = arith.constant 0 : index
    %c0_42 = arith.constant 0 : index
    %30 = vector.load %arg15[%c0_39, %c9_40, %c0_41, %c0_42] : memref<1x10x8x8xf32, #tpu.memory_space<vmem>>, vector<1x1x8x8xf32>
    tpu.vector_store %arg15[%c0_39, %c9_40, %c0_41, %c0_42], %23 {strides = array<i32>} : memref<1x10x8x8xf32, #tpu.memory_space<vmem>>, vector<1x1x8x8xf32>,
    %c0_43 = arith.constant 0 : index
    %c1 = arith.constant 1 : index
    %c0_44 = arith.constant 0 : index
    %c0_45 = arith.constant 0 : index
    %31 = vector.load %arg14[%c0_43, %c1, %c0_44, %c0_45] : memref<1x10x8x8xf32, #tpu.memory_space<vmem>>, vector<1x8x8x8xf32>
    tpu.vector_store %arg14[%c0_43, %c1, %c0_44, %c0_45], %22 {strides = array<i32>} : memref<1x10x8x8xf32, #tpu.memory_space<vmem>>, vector<1x8x8x8xf32>,
    %32 = vector.extract_strided_slice %22 {offsets = [0, 0, 0, 0], sizes = [1, 8, 7, 8], strides = [1, 1, 1, 1]} : vector<1x8x8x8xf32> to vector<1x8x7x8xf32>
    %c0_46 = arith.constant 0 : index
    %c1_47 = arith.constant 1 : index
    %c1_48 = arith.constant 1 : index
    %c0_49 = arith.constant 0 : index
    %33 = vector.load %arg13[%c0_46, %c1_47, %c1_48, %c0_49] : memref<1x10x8x8xf32, #tpu.memory_space<vmem>>, vector<1x8x7x8xf32>
    tpu.vector_store %arg13[%c0_46, %c1_47, %c1_48, %c0_49], %32 {strides = array<i32>} : memref<1x10x8x8xf32, #tpu.memory_space<vmem>>, vector<1x8x7x8xf32>,
    %c0_50 = arith.constant 0 : index
    %c1_51 = arith.constant 1 : index
    %c0_52 = arith.constant 0 : index
    %c0_53 = arith.constant 0 : index
    %34 = vector.load %arg13[%c0_50, %c1_51, %c0_52, %c0_53] : memref<1x10x8x8xf32, #tpu.memory_space<vmem>>, vector<1x8x1x8xf32>
    tpu.vector_store %arg13[%c0_50, %c1_51, %c0_52, %c0_53], %24 {strides = array<i32>} : memref<1x10x8x8xf32, #tpu.memory_space<vmem>>, vector<1x8x1x8xf32>,
    %35 = vector.extract_strided_slice %22 {offsets = [0, 0, 1, 0], sizes = [1, 8, 7, 8], strides = [1, 1, 1, 1]} : vector<1x8x8x8xf32> to vector<1x8x7x8xf32>
    %c0_54 = arith.constant 0 : index
    %c1_55 = arith.constant 1 : index
    %c0_56 = arith.constant 0 : index
    %c0_57 = arith.constant 0 : index
    %36 = vector.load %arg15[%c0_54, %c1_55, %c0_56, %c0_57] : memref<1x10x8x8xf32, #tpu.memory_space<vmem>>, vector<1x8x7x8xf32>
    tpu.vector_store %arg15[%c0_54, %c1_55, %c0_56, %c0_57], %35 {strides = array<i32>} : memref<1x10x8x8xf32, #tpu.memory_space<vmem>>, vector<1x8x7x8xf32>,
    %c0_58 = arith.constant 0 : index
    %c1_59 = arith.constant 1 : index
    %c7 = arith.constant 7 : index
    %c0_60 = arith.constant 0 : index
    %37 = vector.load %arg15[%c0_58, %c1_59, %c7, %c0_60] : memref<1x10x8x8xf32, #tpu.memory_space<vmem>>, vector<1x8x1x8xf32>
    tpu.vector_store %arg15[%c0_58, %c1_59, %c7, %c0_60], %24 {strides = array<i32>} : memref<1x10x8x8xf32, #tpu.memory_space<vmem>>, vector<1x8x1x8xf32>,
    %c0_61 = arith.constant 0 : index
    %c0_62 = arith.constant 0 : index
    %c0_63 = arith.constant 0 : index
    %c0_64 = arith.constant 0 : index
    %38 = vector.load %arg13[%c0_61, %c0_62, %c0_63, %c0_64] : memref<1x10x8x8xf32, #tpu.memory_space<vmem>>, vector<1x8x8x8xf32>
    %39 = vector.shape_cast %38 : vector<1x8x8x8xf32> to vector<64x8xf32>
    %c0_65 = arith.constant 0 : index
    %c0_66 = arith.constant 0 : index
    %c0_67 = arith.constant 0 : index
    %40 = vector.load %arg8[%c0_65, %c0_66, %c0_67] : memref<9x8x8xf32, #tpu.memory_space<vmem>>, vector<1x8x8xf32>
    %41 = vector.shape_cast %40 : vector<1x8x8xf32> to vector<8x8xf32>
    %cst_68 = arith.constant dense<0.000000e+00> : vector<64x8xf32>
    %42 = tpu.matmul %39, %41, %cst_68 {dimension_numbers = #tpu.dot_dimension_numbers<[1], [0], [0], [1], [0, 0, 1, 1], [], []>} : vector<64x8xf32>, vector<8x8xf32>, vector<64x8xf32> -> vector<64x8xf32>
    %c0_69 = arith.constant 0 : index
    %c0_70 = arith.constant 0 : index
    %43 = vector.load %arg16[%c0_69, %c0_70] : memref<64x8xf32, #tpu.memory_space<vmem>>, vector<64x8xf32>
    tpu.vector_store %arg16[%c0_69, %c0_70], %42 {strides = array<i32>} : memref<64x8xf32, #tpu.memory_space<vmem>>, vector<64x8xf32>,
    %c0_71 = arith.constant 0 : index
    %c0_72 = arith.constant 0 : index
    %c0_73 = arith.constant 0 : index
    %c0_74 = arith.constant 0 : index
    %44 = vector.load %arg14[%c0_71, %c0_72, %c0_73, %c0_74] : memref<1x10x8x8xf32, #tpu.memory_space<vmem>>, vector<1x8x8x8xf32>
    %45 = vector.shape_cast %44 : vector<1x8x8x8xf32> to vector<64x8xf32>
    %c1_75 = arith.constant 1 : index
    %c0_76 = arith.constant 0 : index
    %c0_77 = arith.constant 0 : index
    %46 = vector.load %arg8[%c1_75, %c0_76, %c0_77] : memref<9x8x8xf32, #tpu.memory_space<vmem>>, vector<1x8x8xf32>
    %47 = vector.shape_cast %46 : vector<1x8x8xf32> to vector<8x8xf32>
    %cst_78 = arith.constant dense<0.000000e+00> : vector<64x8xf32>
    %48 = tpu.matmul %45, %47, %cst_78 {dimension_numbers = #tpu.dot_dimension_numbers<[1], [0], [0], [1], [0, 0, 1, 1], [], []>} : vector<64x8xf32>, vector<8x8xf32>, vector<64x8xf32> -> vector<64x8xf32>
    %c0_79 = arith.constant 0 : index
    %c0_80 = arith.constant 0 : index
    %49 = vector.load %arg16[%c0_79, %c0_80] : memref<64x8xf32, #tpu.memory_space<vmem>>, vector<64x8xf32>
    %50 = arith.addf %49, %48 : vector<64x8xf32>
    %c0_81 = arith.constant 0 : index
    %c0_82 = arith.constant 0 : index
    %51 = vector.load %arg16[%c0_81, %c0_82] : memref<64x8xf32, #tpu.memory_space<vmem>>, vector<64x8xf32>
    tpu.vector_store %arg16[%c0_81, %c0_82], %50 {strides = array<i32>} : memref<64x8xf32, #tpu.memory_space<vmem>>, vector<64x8xf32>,
    %c0_83 = arith.constant 0 : index
    %c0_84 = arith.constant 0 : index
    %c0_85 = arith.constant 0 : index
    %c0_86 = arith.constant 0 : index
    %52 = vector.load %arg15[%c0_83, %c0_84, %c0_85, %c0_86] : memref<1x10x8x8xf32, #tpu.memory_space<vmem>>, vector<1x8x8x8xf32>
    %53 = vector.shape_cast %52 : vector<1x8x8x8xf32> to vector<64x8xf32>
    %c2 = arith.constant 2 : index
    %c0_87 = arith.constant 0 : index
    %c0_88 = arith.constant 0 : index
    %54 = vector.load %arg8[%c2, %c0_87, %c0_88] : memref<9x8x8xf32, #tpu.memory_space<vmem>>, vector<1x8x8xf32>
    %55 = vector.shape_cast %54 : vector<1x8x8xf32> to vector<8x8xf32>
    %cst_89 = arith.constant dense<0.000000e+00> : vector<64x8xf32>
    %56 = tpu.matmul %53, %55, %cst_89 {dimension_numbers = #tpu.dot_dimension_numbers<[1], [0], [0], [1], [0, 0, 1, 1], [], []>} : vector<64x8xf32>, vector<8x8xf32>, vector<64x8xf32> -> vector<64x8xf32>
    %c0_90 = arith.constant 0 : index
    %c0_91 = arith.constant 0 : index
    %57 = vector.load %arg16[%c0_90, %c0_91] : memref<64x8xf32, #tpu.memory_space<vmem>>, vector<64x8xf32>
    %58 = arith.addf %57, %56 : vector<64x8xf32>
    %c0_92 = arith.constant 0 : index
    %c0_93 = arith.constant 0 : index
    %59 = vector.load %arg16[%c0_92, %c0_93] : memref<64x8xf32, #tpu.memory_space<vmem>>, vector<64x8xf32>
    tpu.vector_store %arg16[%c0_92, %c0_93], %58 {strides = array<i32>} : memref<64x8xf32, #tpu.memory_space<vmem>>, vector<64x8xf32>,
    %c0_94 = arith.constant 0 : index
    %c1_95 = arith.constant 1 : index
    %c0_96 = arith.constant 0 : index
    %c0_97 = arith.constant 0 : index
    %60 = vector.load %arg13[%c0_94, %c1_95, %c0_96, %c0_97] : memref<1x10x8x8xf32, #tpu.memory_space<vmem>>, vector<1x8x8x8xf32>
    %61 = vector.shape_cast %60 : vector<1x8x8x8xf32> to vector<64x8xf32>
    %c3 = arith.constant 3 : index
    %c0_98 = arith.constant 0 : index
    %c0_99 = arith.constant 0 : index
    %62 = vector.load %arg8[%c3, %c0_98, %c0_99] : memref<9x8x8xf32, #tpu.memory_space<vmem>>, vector<1x8x8xf32>
    %63 = vector.shape_cast %62 : vector<1x8x8xf32> to vector<8x8xf32>
    %cst_100 = arith.constant dense<0.000000e+00> : vector<64x8xf32>
    %64 = tpu.matmul %61, %63, %cst_100 {dimension_numbers = #tpu.dot_dimension_numbers<[1], [0], [0], [1], [0, 0, 1, 1], [], []>} : vector<64x8xf32>, vector<8x8xf32>, vector<64x8xf32> -> vector<64x8xf32>
    %c0_101 = arith.constant 0 : index
    %c0_102 = arith.constant 0 : index
    %65 = vector.load %arg16[%c0_101, %c0_102] : memref<64x8xf32, #tpu.memory_space<vmem>>, vector<64x8xf32>
    %66 = arith.addf %65, %64 : vector<64x8xf32>
    %c0_103 = arith.constant 0 : index
    %c0_104 = arith.constant 0 : index
    %67 = vector.load %arg16[%c0_103, %c0_104] : memref<64x8xf32, #tpu.memory_space<vmem>>, vector<64x8xf32>
    tpu.vector_store %arg16[%c0_103, %c0_104], %66 {strides = array<i32>} : memref<64x8xf32, #tpu.memory_space<vmem>>, vector<64x8xf32>,
    %c0_105 = arith.constant 0 : index
    %c1_106 = arith.constant 1 : index
    %c0_107 = arith.constant 0 : index
    %c0_108 = arith.constant 0 : index
    %68 = vector.load %arg14[%c0_105, %c1_106, %c0_107, %c0_108] : memref<1x10x8x8xf32, #tpu.memory_space<vmem>>, vector<1x8x8x8xf32>
    %69 = vector.shape_cast %68 : vector<1x8x8x8xf32> to vector<64x8xf32>
    %c4 = arith.constant 4 : index
    %c0_109 = arith.constant 0 : index
    %c0_110 = arith.constant 0 : index
    %70 = vector.load %arg8[%c4, %c0_109, %c0_110] : memref<9x8x8xf32, #tpu.memory_space<vmem>>, vector<1x8x8xf32>
    %71 = vector.shape_cast %70 : vector<1x8x8xf32> to vector<8x8xf32>
    %cst_111 = arith.constant dense<0.000000e+00> : vector<64x8xf32>
    %72 = tpu.matmul %69, %71, %cst_111 {dimension_numbers = #tpu.dot_dimension_numbers<[1], [0], [0], [1], [0, 0, 1, 1], [], []>} : vector<64x8xf32>, vector<8x8xf32>, vector<64x8xf32> -> vector<64x8xf32>
    %c0_112 = arith.constant 0 : index
    %c0_113 = arith.constant 0 : index
    %73 = vector.load %arg16[%c0_112, %c0_113] : memref<64x8xf32, #tpu.memory_space<vmem>>, vector<64x8xf32>
    %74 = arith.addf %73, %72 : vector<64x8xf32>
    %c0_114 = arith.constant 0 : index
    %c0_115 = arith.constant 0 : index
    %75 = vector.load %arg16[%c0_114, %c0_115] : memref<64x8xf32, #tpu.memory_space<vmem>>, vector<64x8xf32>
    tpu.vector_store %arg16[%c0_114, %c0_115], %74 {strides = array<i32>} : memref<64x8xf32, #tpu.memory_space<vmem>>, vector<64x8xf32>,
    %c0_116 = arith.constant 0 : index
    %c1_117 = arith.constant 1 : index
    %c0_118 = arith.constant 0 : index
    %c0_119 = arith.constant 0 : index
    %76 = vector.load %arg15[%c0_116, %c1_117, %c0_118, %c0_119] : memref<1x10x8x8xf32, #tpu.memory_space<vmem>>, vector<1x8x8x8xf32>
    %77 = vector.shape_cast %76 : vector<1x8x8x8xf32> to vector<64x8xf32>
    %c5 = arith.constant 5 : index
    %c0_120 = arith.constant 0 : index
    %c0_121 = arith.constant 0 : index
    %78 = vector.load %arg8[%c5, %c0_120, %c0_121] : memref<9x8x8xf32, #tpu.memory_space<vmem>>, vector<1x8x8xf32>
    %79 = vector.shape_cast %78 : vector<1x8x8xf32> to vector<8x8xf32>
    %cst_122 = arith.constant dense<0.000000e+00> : vector<64x8xf32>
    %80 = tpu.matmul %77, %79, %cst_122 {dimension_numbers = #tpu.dot_dimension_numbers<[1], [0], [0], [1], [0, 0, 1, 1], [], []>} : vector<64x8xf32>, vector<8x8xf32>, vector<64x8xf32> -> vector<64x8xf32>
    %c0_123 = arith.constant 0 : index
    %c0_124 = arith.constant 0 : index
    %81 = vector.load %arg16[%c0_123, %c0_124] : memref<64x8xf32, #tpu.memory_space<vmem>>, vector<64x8xf32>
    %82 = arith.addf %81, %80 : vector<64x8xf32>
    %c0_125 = arith.constant 0 : index
    %c0_126 = arith.constant 0 : index
    %83 = vector.load %arg16[%c0_125, %c0_126] : memref<64x8xf32, #tpu.memory_space<vmem>>, vector<64x8xf32>
    tpu.vector_store %arg16[%c0_125, %c0_126], %82 {strides = array<i32>} : memref<64x8xf32, #tpu.memory_space<vmem>>, vector<64x8xf32>,
    %c0_127 = arith.constant 0 : index
    %c2_128 = arith.constant 2 : index
    %c0_129 = arith.constant 0 : index
    %c0_130 = arith.constant 0 : index
    %84 = vector.load %arg13[%c0_127, %c2_128, %c0_129, %c0_130] : memref<1x10x8x8xf32, #tpu.memory_space<vmem>>, vector<1x8x8x8xf32>
    %85 = vector.shape_cast %84 : vector<1x8x8x8xf32> to vector<64x8xf32>
    %c6 = arith.constant 6 : index
    %c0_131 = arith.constant 0 : index
    %c0_132 = arith.constant 0 : index
    %86 = vector.load %arg8[%c6, %c0_131, %c0_132] : memref<9x8x8xf32, #tpu.memory_space<vmem>>, vector<1x8x8xf32>
    %87 = vector.shape_cast %86 : vector<1x8x8xf32> to vector<8x8xf32>
    %cst_133 = arith.constant dense<0.000000e+00> : vector<64x8xf32>
    %88 = tpu.matmul %85, %87, %cst_133 {dimension_numbers = #tpu.dot_dimension_numbers<[1], [0], [0], [1], [0, 0, 1, 1], [], []>} : vector<64x8xf32>, vector<8x8xf32>, vector<64x8xf32> -> vector<64x8xf32>
    %c0_134 = arith.constant 0 : index
    %c0_135 = arith.constant 0 : index
    %89 = vector.load %arg16[%c0_134, %c0_135] : memref<64x8xf32, #tpu.memory_space<vmem>>, vector<64x8xf32>
    %90 = arith.addf %89, %88 : vector<64x8xf32>
    %c0_136 = arith.constant 0 : index
    %c0_137 = arith.constant 0 : index
    %91 = vector.load %arg16[%c0_136, %c0_137] : memref<64x8xf32, #tpu.memory_space<vmem>>, vector<64x8xf32>
    tpu.vector_store %arg16[%c0_136, %c0_137], %90 {strides = array<i32>} : memref<64x8xf32, #tpu.memory_space<vmem>>, vector<64x8xf32>,
    %c0_138 = arith.constant 0 : index
    %c2_139 = arith.constant 2 : index
    %c0_140 = arith.constant 0 : index
    %c0_141 = arith.constant 0 : index
    %92 = vector.load %arg14[%c0_138, %c2_139, %c0_140, %c0_141] : memref<1x10x8x8xf32, #tpu.memory_space<vmem>>, vector<1x8x8x8xf32>
    %93 = vector.shape_cast %92 : vector<1x8x8x8xf32> to vector<64x8xf32>
    %c7_142 = arith.constant 7 : index
    %c0_143 = arith.constant 0 : index
    %c0_144 = arith.constant 0 : index
    %94 = vector.load %arg8[%c7_142, %c0_143, %c0_144] : memref<9x8x8xf32, #tpu.memory_space<vmem>>, vector<1x8x8xf32>
    %95 = vector.shape_cast %94 : vector<1x8x8xf32> to vector<8x8xf32>
    %cst_145 = arith.constant dense<0.000000e+00> : vector<64x8xf32>
    %96 = tpu.matmul %93, %95, %cst_145 {dimension_numbers = #tpu.dot_dimension_numbers<[1], [0], [0], [1], [0, 0, 1, 1], [], []>} : vector<64x8xf32>, vector<8x8xf32>, vector<64x8xf32> -> vector<64x8xf32>
    %c0_146 = arith.constant 0 : index
    %c0_147 = arith.constant 0 : index
    %97 = vector.load %arg16[%c0_146, %c0_147] : memref<64x8xf32, #tpu.memory_space<vmem>>, vector<64x8xf32>
    %98 = arith.addf %97, %96 : vector<64x8xf32>
    %c0_148 = arith.constant 0 : index
    %c0_149 = arith.constant 0 : index
    %99 = vector.load %arg16[%c0_148, %c0_149] : memref<64x8xf32, #tpu.memory_space<vmem>>, vector<64x8xf32>
    tpu.vector_store %arg16[%c0_148, %c0_149], %98 {strides = array<i32>} : memref<64x8xf32, #tpu.memory_space<vmem>>, vector<64x8xf32>,
    %c0_150 = arith.constant 0 : index
    %c2_151 = arith.constant 2 : index
    %c0_152 = arith.constant 0 : index
    %c0_153 = arith.constant 0 : index
    %100 = vector.load %arg15[%c0_150, %c2_151, %c0_152, %c0_153] : memref<1x10x8x8xf32, #tpu.memory_space<vmem>>, vector<1x8x8x8xf32>
    %101 = vector.shape_cast %100 : vector<1x8x8x8xf32> to vector<64x8xf32>
    %c8 = arith.constant 8 : index
    %c0_154 = arith.constant 0 : index
    %c0_155 = arith.constant 0 : index
    %102 = vector.load %arg8[%c8, %c0_154, %c0_155] : memref<9x8x8xf32, #tpu.memory_space<vmem>>, vector<1x8x8xf32>
    %103 = vector.shape_cast %102 : vector<1x8x8xf32> to vector<8x8xf32>
    %cst_156 = arith.constant dense<0.000000e+00> : vector<64x8xf32>
    %104 = tpu.matmul %101, %103, %cst_156 {dimension_numbers = #tpu.dot_dimension_numbers<[1], [0], [0], [1], [0, 0, 1, 1], [], []>} : vector<64x8xf32>, vector<8x8xf32>, vector<64x8xf32> -> vector<64x8xf32>
    %c0_157 = arith.constant 0 : index
    %c0_158 = arith.constant 0 : index
    %105 = vector.load %arg16[%c0_157, %c0_158] : memref<64x8xf32, #tpu.memory_space<vmem>>, vector<64x8xf32>
    %106 = arith.addf %105, %104 : vector<64x8xf32>
    %c0_159 = arith.constant 0 : index
    %c0_160 = arith.constant 0 : index
    %107 = vector.load %arg16[%c0_159, %c0_160] : memref<64x8xf32, #tpu.memory_space<vmem>>, vector<64x8xf32>
    tpu.vector_store %arg16[%c0_159, %c0_160], %106 {strides = array<i32>} : memref<64x8xf32, #tpu.memory_space<vmem>>, vector<64x8xf32>,
    %c0_161 = arith.constant 0 : index
    %c0_162 = arith.constant 0 : index
    %108 = vector.load %arg16[%c0_161, %c0_162] : memref<64x8xf32, #tpu.memory_space<vmem>>, vector<64x8xf32>
    %c0_163 = arith.constant 0 : index
    %c0_164 = arith.constant 0 : index
    %109 = vector.load %arg5[%c0_163, %c0_164] : memref<1x8xf32, #tpu.memory_space<vmem>>, vector<1x8xf32>
    %110 = vector.broadcast %109 : vector<1x8xf32> to vector<64x8xf32>
    %111 = arith.mulf %108, %110 : vector<64x8xf32>
    %c0_165 = arith.constant 0 : index
    %c0_166 = arith.constant 0 : index
    %112 = vector.load %arg6[%c0_165, %c0_166] : memref<1x8xf32, #tpu.memory_space<vmem>>, vector<1x8xf32>
    %113 = vector.broadcast %112 : vector<1x8xf32> to vector<64x8xf32>
    %114 = arith.addf %111, %113 : vector<64x8xf32>
    %cst_167 = arith.constant 0.000000e+00 : f32
    %115 = vector.broadcast %cst_167 : f32 to vector<64x8xf32>
    %116 = arith.maximumf %114, %115 : vector<64x8xf32>
    %c0_168 = arith.constant 0 : index
    %c0_169 = arith.constant 0 : index
    %117 = vector.load %arg9[%c0_168, %c0_169] : memref<8x128xf32, #tpu.memory_space<vmem>>, vector<8x128xf32>
    %cst_170 = arith.constant dense<0.000000e+00> : vector<64x128xf32>
    %118 = tpu.matmul %116, %117, %cst_170 {dimension_numbers = #tpu.dot_dimension_numbers<[1], [0], [0], [1], [0, 0, 1, 1], [], []>} : vector<64x8xf32>, vector<8x128xf32>, vector<64x128xf32> -> vector<64x128xf32>
    %119 = arith.addf %118, %11 : vector<64x128xf32>
    %120 = vector.shape_cast %119 : vector<64x128xf32> to vector<1x8x8x128xf32>
    %c0_171 = arith.constant 0 : index
    %c0_172 = arith.constant 0 : index
    %c0_173 = arith.constant 0 : index
    %c0_174 = arith.constant 0 : index
    %121 = vector.load %arg12[%c0_171, %c0_172, %c0_173, %c0_174] : memref<1x8x8x128xf32, #tpu.memory_space<vmem>>, vector<1x8x8x128xf32>
    tpu.vector_store %arg12[%c0_171, %c0_172, %c0_173, %c0_174], %120 {strides = array<i32>} : memref<1x8x8x128xf32, #tpu.memory_space<vmem>>, vector<1x8x8x128xf32>,
    return
  }
  func.func @transform_0(%arg0: i32) -> (i32, i32) {
    %c0_i32 = arith.constant 0 : i32
    %c0_i32_0 = arith.constant 0 : i32
    %c0_i32_1 = arith.constant 0 : i32
    return %c0_i32, %c0_i32_0 : i32, i32
  }
  func.func @transform_1(%arg0: i32) -> (i32, i32) {
    %c0_i32 = arith.constant 0 : i32
    %c0_i32_0 = arith.constant 0 : i32
    %c0_i32_1 = arith.constant 0 : i32
    return %c0_i32, %c0_i32_0 : i32, i32
  }
  func.func @transform_2(%arg0: i32) -> (i32, i32) {
    %c0_i32 = arith.constant 0 : i32
    %c0_i32_0 = arith.constant 0 : i32
    %c0_i32_1 = arith.constant 0 : i32
    return %c0_i32, %c0_i32_0 : i32, i32
  }
  func.func @transform_3(%arg0: i32) -> (i32, i32) {
    %c0_i32 = arith.constant 0 : i32
    %c0_i32_0 = arith.constant 0 : i32
    %c0_i32_1 = arith.constant 0 : i32
    return %c0_i32, %c0_i32_0 : i32, i32
  }
  func.func @transform_4(%arg0: i32) -> (i32, i32) {
    %c0_i32 = arith.constant 0 : i32
    %c0_i32_0 = arith.constant 0 : i32
    %c0_i32_1 = arith.constant 0 : i32
    return %c0_i32, %c0_i32_0 : i32, i32
  }
  func.func @transform_5(%arg0: i32) -> (i32, i32) {
    %c0_i32 = arith.constant 0 : i32
    %c0_i32_0 = arith.constant 0 : i32
    %c0_i32_1 = arith.constant 0 : i32
    return %c0_i32, %c0_i32_0 : i32, i32
  }
  func.func @transform_6(%arg0: i32) -> (i32, i32) {
    %c0_i32 = arith.constant 0 : i32
    %c0_i32_0 = arith.constant 0 : i32
    %c0_i32_1 = arith.constant 0 : i32
    return %c0_i32, %c0_i32_0 : i32, i32
  }
  func.func @transform_7(%arg0: i32) -> (i32, i32, i32) {
    %c0_i32 = arith.constant 0 : i32
    %c0_i32_0 = arith.constant 0 : i32
    %c0_i32_1 = arith.constant 0 : i32
    %c0_i32_2 = arith.constant 0 : i32
    return %c0_i32, %c0_i32_0, %c0_i32_1 : i32, i32, i32
  }
  func.func @transform_8(%arg0: i32) -> (i32, i32) {
    %c0_i32 = arith.constant 0 : i32
    %c0_i32_0 = arith.constant 0 : i32
    %c0_i32_1 = arith.constant 0 : i32
    return %c0_i32, %c0_i32_0 : i32, i32
  }
  func.func @transform_9(%arg0: i32) -> (i32, i32) {
    %c0_i32 = arith.constant 0 : i32
    %c0_i32_0 = arith.constant 0 : i32
    %c0_i32_1 = arith.constant 0 : i32
    return %c0_i32, %c0_i32_0 : i32, i32
  }
  func.func @transform_10(%arg0: i32) -> (i32, i32, i32, i32) {
    %c0_i32 = arith.constant 0 : i32
    %c0_i32_0 = arith.constant 0 : i32
    %c0_i32_1 = arith.constant 0 : i32
    %c0_i32_2 = arith.constant 0 : i32
    return %arg0, %c0_i32, %c0_i32_0, %c0_i32_1 : i32, i32, i32, i32
  }
  func.func @transform_11(%arg0: i32) -> (i32, i32, i32, i32) {
    %c0_i32 = arith.constant 0 : i32
    %c0_i32_0 = arith.constant 0 : i32
    %c0_i32_1 = arith.constant 0 : i32
    %c0_i32_2 = arith.constant 0 : i32
    return %arg0, %c0_i32, %c0_i32_0, %c0_i32_1 : i32, i32, i32, i32
  }
}

</mosaic_0001>

<bundles_post_ra>
// kernel: tpu_custom_call.1
= control target key start
LH: loop header
LB: loop body
LE: loop exit
PB: predicated region body
PF: predicated region fallthrough
CT: control target
= control target key end

     0   :  { %s3563_s0 = inlined_call_operand.vmem [shape: f32[1,16], index: 0, kind: input, shape index: {}]   ;;  %s3564_s1 = inlined_call_operand.vmem [shape: f32[1,16], index: 1, kind: input, shape index: {}]   ;;  %s3565_s2 = inlined_call_operand.vmem [shape: f32[1,8], index: 2, kind: input, shape index: {}]   ;;  %s3566_s3 = inlined_call_operand.vmem [shape: f32[1,8], index: 3, kind: input, shape index: {}]   ;;  %s3567_s4 = inlined_call_operand.vmem [shape: f32[1,8], index: 4, kind: input, shape index: {}]   ;;  %s3568_s5 = inlined_call_operand.vmem [shape: f32[1,8], index: 5, kind: input, shape index: {}]   ;;  %s3569_s6 = inlined_call_operand.vmem [shape: f32[16,8], index: 6, kind: input, shape index: {}]   ;;  %s3570_s7 = inlined_call_operand.vmem [shape: f32[9,8,8], index: 7, kind: input, shape index: {}]   ;;  %s3571_s8 = inlined_call_operand.vmem [shape: f32[8,128], index: 8, kind: input, shape index: {}]   ;;  %s3572_s9 = inlined_call_operand.vmem [shape: f32[16,128], index: 9, kind: input, shape index: {}]   ;;  %s3573_s10 = inlined_call_operand.vmem [shape: f32[2,8,8,16], index: 10, kind: input, shape index: {}]   ;;  %s3574_s11 = inlined_call_operand.hbm [shape: f32[2,8,8,128], index: 11, kind: output, shape index: {}]  }
   0x1   :  { %3575 = sst [smem:[#allocation10_spill]] %s3572_s9 }
   0x2   :  { %16 = vsyncpa [#allocation7], 0 }
   0x3   :  { %18 = vsyncpa [#allocation7 + $0x1], 0  ;;  %s3069_s17 = smov 0   ;;  %s3071_s18 = smov 0  }
   0x4   :  { %s3073_s19 = smov 0   ;;  %s3075_s20 = smov 0  }
   0x5 LB: > { %s3090_s21 = sadd.s32 4294967295, %s3003_s20   ;;  %s2477_s22 = sadd.s32 4294967294, %s3003_s20   ;;  %s3003_s20 = sphi %s3075_s20, %s3584_s20   ;;  %s2999_s19 = sphi %s3073_s19, %s3583_s19   ;;  %s2995_s18 = sphi %s3071_s18, %s3582_s18   ;;  %s2991_s17 = sphi %s3069_s17, %s3581_s17  }
   0x6   : > { %s3094_s23 = sadd.s32 1, %s3003_s20   ;;  %s267_s24 = sadd.s32 1, %s2999_s19 }
   0x7   : > { %s264_s25 = ssub.s32 %s3003_s20, %s3094_s23  ;;  %p277_p0 = scmp.ne.s32.totalorder %s2999_s19, %s2995_s18 }
   0x8   : > { %p265_p1 = scmp.eq.s32.totalorder %s264_s25, 0  ;;  %p278_p2 = scmp.eq.s32.totalorder %s3090_s21, 1 }
   0x9   : > { %p283_p3 = scmp.ne.s32.totalorder %s2995_s18, %s2991_s17  ;;  %p284_p4 = scmp.eq.s32.totalorder %s2477_s22, 1 }
   0xa   : > { %s3105_s26 = scalar_select %p265_p1, %s2999_s19, %s267_s24  }
   0xb   : > { %p3107_p5 = por %p278_p2, %p277_p0  ;;  %p3111_p6 = por %p284_p4, %p283_p3 }
   0xc   : > { %3576 = sst [smem:[#allocation9_spill]] %s3105_s26  ;;  %p2480_p7 = scmp.ge.s32.totalorder %s3003_s20, 1 }
   0xd   : > { %p340_p8 = scmp.lt.s32.totalorder %s3003_s20, 3 }
   0xf   : > { %p341_p9 = pnand %p2480_p7, %p340_p8 }
  0x10   : > { %s3579_s9 = sld [smem:[#allocation10_spill]] (!%p341_p9)  ;;  %p380_p10 = scmp.lt.s32.totalorder (!%p341_p9), %s3090_s21, 1  ;;  %v563_v3 = vld [vmem:[%s3569_s6] sm:$0xff] (!%p341_p9)  ;;  %v564_v4 = vld [vmem:[%s3569_s6 + $0x8] sm:$0xff] (!%p341_p9)  ;;  %vm433_vm0 = vcmask (!%p341_p9), 130048   ;;  %vm708_vm1 = vcmask (!%p341_p9), 64512  }
  0x11   : > { %344 = sbr.rel (%p341_p9) target bundleno = 829 (0x33d), region = 64  ;;  %v2887_v5 = vpack.c.bf16 (!%p341_p9), %v564_v4, %v563_v3  ;;  %v2484_v6 = vld [vmem:[%s3563_s0] ss:$0 sm:$0xff] (!%p341_p9)  ;;  %vm737_vm2 = vcmask (!%p341_p9), 57344   ;;  %v3005_v40 = vmov (!%p341_p9), 0.0   ;;  %v2512_v41 = vld [vmem:[%s3570_s7 + $0x8] sm:$0xff] (!%p341_p9) }
  0x12   : > { %v2485_v7 = vld [vmem:[%s3564_s1] ss:$0 sm:$0xff] (!%p341_p9)  ;;  %709 = vst.msk [vmem:[#allocation2] sm:$0xff] (!%p341_p9), %vm708_vm1, %v3005_v40  ;;  %711 = vst.msk [vmem:[#allocation2 + $0x48] sm:$0xff] (!%p341_p9), %vm708_vm1, %v3005_v40  ;;  %v3189_v45 = vld [vmem:[%s3570_s7 + $0x10] sm:$0xff] (!%p341_p9)  ;;  %vm728_vm3 = vcmask (!%p341_p9), 63488  }
  0x13   : > { %712 = vst.msk [vmem:[#allocation3] sm:$0xff] (!%p341_p9), %vm708_vm1, %v3005_v40  ;;  %714 = vst.msk [vmem:[#allocation3 + $0x48] sm:$0xff] (!%p341_p9), %vm708_vm1, %v3005_v40  ;;  %v772_v42 = vld [vmem:[%s3570_s7] sm:$0xff] (!%p341_p9)  ;;  %v3195_v46 = vld [vmem:[%s3570_s7 + $0x18] sm:$0xff] (!%p341_p9)  ;;  %vm747_vm4 = vcmask (!%p341_p9), 64513   ;;  %s377_s22 = sand.u32 (!%p341_p9), 1, %s2995_s18  }
  0x14   : > { %715 = vst.msk [vmem:[#allocation4] sm:$0xff] (!%p341_p9), %vm708_vm1, %v3005_v40  ;;  %717 = vst.msk [vmem:[#allocation4 + $0x48] sm:$0xff] (!%p341_p9), %vm708_vm1, %v3005_v40  ;;  %2743 = vmatprep.subr.mxu0 (!%p341_p9), %v772_v42  ;;  %v2502_v55 = vld [vmem:[%s3565_s2] ss:$0 sm:$0xff] (!%p341_p9)  ;;  %s2600_s29 = sshll.u32 (!%p341_p9), %s3090_s21, 10  ;;  %s3006_s26 = smov (!%p341_p9), [#allocation6]  }
  0x15   : > { %738 = vst.msk [vmem:[#allocation2 + $0x8] sm:$0x1] (!%p341_p9), %vm737_vm2, %v3005_v40  ;;  %739 = vst.msk [vmem:[#allocation2 + $0x10] sm:$0x1] (!%p341_p9), %vm737_vm2, %v3005_v40  ;;  %2744 = vmatpush3.msra.mxu0 (!%p341_p9), %v772_v42  ;;  %v2503_v57 = vld [vmem:[%s3566_s3] ss:$0 sm:$0xff] (!%p341_p9)  ;;  %s3515_s14 = scalar_lea.hbm (!%p341_p9), %s3574_s11, %s2600_s29 }
  0x16   : > { %v431_v0 = vld [vmem:[%s3579_s9] sm:$0xff] (!%p341_p9)  ;;  %v432_v1 = vld [vmem:[%s3579_s9 + $0x8] sm:$0xff] (!%p341_p9)  ;;  %740 = vst.msk [vmem:[#allocation2 + $0x18] sm:$0x1] (!%p341_p9), %vm737_vm2, %v3005_v40  ;;  %741 = vst.msk [vmem:[#allocation2 + $0x20] sm:$0x1] (!%p341_p9), %vm737_vm2, %v3005_v40  ;;  %2771 = vmatprep.subr.mxu0 (!%p341_p9), %v3189_v45 }
  0x17   : > { %v2883_v2 = vpack.c.bf16 (!%p341_p9), %v432_v1, %v431_v0  ;;  %742 = vst.msk [vmem:[#allocation2 + $0x28] sm:$0x1] (!%p341_p9), %vm737_vm2, %v3005_v40  ;;  %743 = vst.msk [vmem:[#allocation2 + $0x30] sm:$0x1] (!%p341_p9), %vm737_vm2, %v3005_v40  ;;  %s2945_s15 = sshll.u32 (!%p341_p9), %s3006_s26, 4  ;;  %s2946_s15 = int_to_ptr.vmem [resolvable:$false] %s2945_s15 }
  0x18   : > { %s381_s24 = scalar_select %p380_p10, %s3090_s21, 1  ;;  %744 = vst.msk [vmem:[#allocation2 + $0x38] sm:$0x1] %vm737_vm2, %v3005_v40  ;;  %745 = vst.msk [vmem:[#allocation2 + $0x40] sm:$0x1] %vm737_vm2, %v3005_v40 }
  0x19   : > { %2884 = vmatprep.subr.bf16.mxu1 %v2883_v2  ;;  %756 = vst.msk [vmem:[#allocation4 + $0xf] sm:$0x1] %vm737_vm2, %v3005_v40  ;;  %757 = vst.msk [vmem:[#allocation4 + $0x17] sm:$0x1] %vm737_vm2, %v3005_v40  ;;  %v764_v43 = vld [vmem:[#allocation2] sm:$0xff]  ;;  %s3522_s21 = scalar_lea.sflag [#allocation7], %s377_s22 }
  0x1a   : > { %2886 = vmatpush3.bf16.msra.mxu1 %v2883_v2  ;;  %s2599_s25 = sshll.u32 %s381_s24, 6  ;;  %758 = vst.msk [vmem:[#allocation4 + $0x1f] sm:$0x1] %vm737_vm2, %v3005_v40  ;;  %759 = vst.msk [vmem:[#allocation4 + $0x27] sm:$0x1] %vm737_vm2, %v3005_v40  ;;  %v910_v44 = vld [vmem:[#allocation3] sm:$0xff]  ;;  %2745 = vmatprep.mubr.msk.f32.mxu0 %vm708_vm1, %v764_v43 }
  0x1b   : > { %s384_s9 = scalar_lea.vmem %s3573_s10, %s2599_s25  ;;  %2888 = vmatprep.subr.bf16.mxu1 %v2887_v5  ;;  %760 = vst.msk [vmem:[#allocation4 + $0x2f] sm:$0x1] %vm737_vm2, %v3005_v40  ;;  %761 = vst.msk [vmem:[#allocation4 + $0x37] sm:$0x1] %vm737_vm2, %v3005_v40  ;;  %s2481_s24 = sshll.u32 %s377_s22, 6 }
  0x1c   : > { %v385_v8 = vld [vmem:[%s384_s9] sm:$0xff]  ;;  %v386_v9 = vld [vmem:[%s384_s9 + $0x8] sm:$0xff]  ;;  %v387_v10 = vld [vmem:[%s384_s9 + $0x10] sm:$0xff]  ;;  %762 = vst.msk [vmem:[#allocation4 + $0x3f] sm:$0x1] %vm737_vm2, %v3005_v40  ;;  %s379_s25 = scalar_lea.vmem [#allocation6], %s2481_s24 }
  0x1d   : > { %v400_v11 = vmul.f32 %v2484_v6, %v385_v8  ;;  %v401_v12 = vmul.f32 %v2484_v6, %v386_v9  ;;  %v402_v13 = vmul.f32 %v2484_v6, %v387_v10  ;;  %v388_v14 = vld [vmem:[%s384_s9 + $0x18] sm:$0xff]  ;;  %v389_v15 = vld [vmem:[%s384_s9 + $0x20] sm:$0xff]  ;;  %v390_v16 = vld [vmem:[%s384_s9 + $0x28] sm:$0xff]  ;;  %763 = vst.msk [vmem:[#allocation4 + $0x47] sm:$0x1] %vm737_vm2, %v3005_v40  ;;  %s2415_s30 = sshll.u32 %s379_s25, 4  ;;  %s3517_s30 = int_to_ptr.vmem [resolvable:$true] %s2415_s30 }
  0x1e   : > { %v403_v17 = vmul.f32 %v2484_v6, %v388_v14  ;;  %v404_v18 = vmul.f32 %v2484_v6, %v389_v15  ;;  %v391_v19 = vld [vmem:[%s384_s9 + $0x30] sm:$0xff]  ;;  %v405_v24 = vmul.f32 %v2484_v6, %v390_v16  ;;  %v392_v30 = vld [vmem:[%s384_s9 + $0x38] sm:$0xff]  ;;  %s2941_s9 = scalar_lea.vmem %s3517_s30, 1024  ;;  %s2947_s16 = scalar_lea.vmem %s2946_s15, 2048 }
  0x1f   : > { %v415_v20 = vadd.f32 %v2485_v7, %v400_v11  ;;  %v416_v21 = vadd.f32 %v2485_v7, %v401_v12  ;;  %v417_v22 = vadd.f32 %v2485_v7, %v402_v13  ;;  %v406_v25 = vmul.f32 %v2484_v6, %v391_v19  ;;  %p2942_p11 = scmp.ne.s32.totalorder %s3517_s30, %s2941_s9  ;;  %p2948_p0 = scmp.lt.s32.totalorder %s3517_s30, %s2946_s15 }
  0x20   : > { %v418_v23 = vadd.f32 %v2485_v7, %v403_v17  ;;  %v419_v29 = vadd.f32 %v2485_v7, %v404_v18  ;;  %v420_v32 = vadd.f32 %v2485_v7, %v405_v24  ;;  %v407_v33 = vmul.f32 %v2484_v6, %v392_v30  ;;  %v2539_v24 = vld [vmem:[%s3570_s7 + $0x20] sm:$0xff]  ;;  %p2949_p1 = scmp.lt.s32.totalorder %s2947_s16, %s2941_s9 }
  0x21   : > { %v423_v26 = vmax.f32 %v415_v20, 0.0  ;;  %v424_v27 = vmax.f32 %v416_v21, 0.0  ;;  %v425_v28 = vmax.f32 %v417_v22, 0.0  ;;  %v421_v35 = vadd.f32 %v2485_v7, %v406_v25  ;;  %p2943_p12 = pnand %p2942_p11, %p3107_p5 }
  0x22   : > { %v426_v31 = vmax.f32 %v418_v23, 0.0  ;;  %v427_v34 = vmax.f32 %v419_v29, 0.0  ;;  %v428_v36 = vmax.f32 %v420_v32, 0.0  ;;  %v422_v37 = vadd.f32 %v2485_v7, %v407_v33  ;;  %p2950_p2 = por %p2949_p1, %p2948_p0 }
  0x23   : > { %2715 = vmatprep.mubr.msk.f32.mxu1 %vm433_vm0, %v423_v26  ;;  %v429_v38 = vmax.f32 %v421_v35, 0.0  ;;  %p2944_p13 = pneg %p2943_p12 }
  0x24   : > { %2716 = vmatmul.mubr.msk.f32.vlgmr.msra.gmra.mrb[0].mxu1 %vm433_vm0, %v424_v27  ;;  %v430_v39 = vmax.f32 %v422_v37, 0.0 }
  0x25   : > { %2890 = vmatpush3.bf16.msra.mxu1 %v2887_v5  ;;  %2718 = vmatprep.mubr.msk.f32.mxu1 %vm433_vm0, %v425_v28  ;;  %p2951_p3 = pnand %p2950_p2, %p2944_p13 }
  0x26   : > { %2757 = vmatprep.subr.mxu1 %v2512_v41 }
  0x28   : > { %2719 = vmatmul.mubr.msk.f32.gmra.mrb[2].mxu1 %vm433_vm0, %v426_v31 }
  0x29   : > { %2721 = vmatprep.mubr.msk.f32.mxu1 %vm433_vm0, %v427_v34 }
  0x2c   : > { %2722 = vmatmul.mubr.msk.f32.gmra.mrb[4].mxu1 %vm433_vm0, %v428_v36 }
  0x2d   : > { %2724 = vmatprep.mubr.msk.f32.mxu1 %vm433_vm0, %v429_v38 }
  0x30   : > { %2725 = vmatmul.mubr.msk.f32.gmra.mrb[6].mxu1 %vm433_vm0, %v430_v39 }
  0x31   : > { %2731 = vmatprep.mubr.msk.f32.mxu1 %vm433_vm0, %v423_v26 }
  0x34   : > { %2732 = vmatmul.mubr.msk.f32.vlgmr.msra.gmra.mrb[8].mxu1 %vm433_vm0, %v424_v27 }
  0x35   : > { %2734 = vmatprep.mubr.msk.f32.mxu1 %vm433_vm0, %v425_v28  ;;  %2758 = vmatpush3.msra.mxu1 %v2512_v41  ;;  %v2548_v28 = vld [vmem:[%s3570_s7 + $0x28] sm:$0xff] }
  0x36   : > { %2785 = vmatprep.subr.mxu1 %v3195_v46 }
  0x38   : > { %2735 = vmatmul.mubr.msk.f32.gmra.mrb[10].mxu1 %vm433_vm0, %v426_v31 }
  0x39   : > { %2737 = vmatprep.mubr.msk.f32.mxu1 %vm433_vm0, %v427_v34 }
  0x3c   : > { %2738 = vmatmul.mubr.msk.f32.gmra.mrb[12].mxu1 %vm433_vm0, %v428_v36 }
  0x3d   : > { %2740 = vmatprep.mubr.msk.f32.mxu1 %vm433_vm0, %v429_v38 }
  0x40   : > { %2741 = vmatmul.mubr.msk.f32.gmra.mrb[14].mxu1 %vm433_vm0, %v430_v39  ;;  %v1073_v39 = vld [vmem:[#allocation4] sm:$0xff] }
  0x41   : > { %2759 = vmatprep.mubr.msk.f32.mxu1 %vm708_vm1, %v910_v44  ;;  %v2557_v44 = vld [vmem:[%s3570_s7 + $0x30] sm:$0xff] }
  0xf7   : > { %v3198_v47 = vpop.f32.mrb[0].mxu1 }
  0xf8   : > { %v3200_v48 = vpop.f32.mrb[1].mxu1 }
  0xfb   : > { %v3202_v49 = vpop.f32.mrb[2].mxu1 }
  0xfc   : > { %v3204_v50 = vpop.f32.mrb[3].mxu1 }
  0xff   : > { %v3206_v51 = vpop.f32.mrb[4].mxu1 }
 0x100   : > { %v3208_v52 = vpop.f32.mrb[5].mxu1 }
 0x103   : > { %v3210_v53 = vpop.f32.mrb[6].mxu1 }
 0x104   : > { %v3212_v54 = vpop.f32.mrb[7].mxu1 }
 0x107   : > { %v2733_v56 = vpop.f32.mrb[8].mxu1 }
 0x108   : > { %v678_v58 = vmul.f32 %v2733_v56, %v2502_v55  ;;  %v631_v59 = vpop.f32.mrb[9].mxu1 }
 0x109   : > { %v677_v60 = vmul.f32 %v2502_v55, %v631_v59 }
 0x10a   : > { %v693_v61 = vadd.f32 %v2503_v57, %v678_v58 }
 0x10b   : > { %v692_v62 = vadd.f32 %v2503_v57, %v677_v60  ;;  %v2736_v63 = vpop.f32.mrb[10].mxu1  ;;  %v2575_v60 = vld [vmem:[%s3570_s7 + $0x40] sm:$0xff] }
 0x10c   : > { %v701_v0 = vmax.f32 %v693_v61, 0.0  ;;  %v680_v1 = vmul.f32 %v2736_v63, %v2502_v55  ;;  %v641_v2 = vpop.f32.mrb[11].mxu1  ;;  %v1733_v63 = vld [vmem:[#allocation2 + $0x48] sm:$0xff] }
 0x10d   : > { %v700_v3 = vmax.f32 %v692_v62, 0.0  ;;  %v679_v4 = vmul.f32 %v2502_v55, %v641_v2  ;;  %v2263_v2 = vld [vmem:[%s3571_s8] sm:$0xff] }
 0x10e   : > { %720 = vst.msk [vmem:[#allocation3 + $0x10] sm:$0xff] %vm708_vm1, %v701_v0  ;;  %v695_v5 = vadd.f32 %v2503_v57, %v680_v1  ;;  %v2061_v1 = vld [vmem:[#allocation4 + $0x48] sm:$0xff] }
 0x10f   : > { %730 = vst.msk [vmem:[#allocation2 + $0x11] sm:$0x7f] %vm728_vm3, %v701_v0  ;;  %729 = vst.msk [vmem:[#allocation2 + $0x9] sm:$0x7f] %vm728_vm3, %v700_v3  ;;  %v694_v6 = vadd.f32 %v2503_v57, %v679_v4  ;;  %v2739_v7 = vpop.f32.mrb[12].mxu1 }
 0x110   : > { %749 = vst.msk [vmem:[#allocation4 + $0xf] sm:$0xfe] %vm747_vm4, %v701_v0  ;;  %748 = vst.msk [vmem:[#allocation4 + $0x7] sm:$0xfe] %vm747_vm4, %v700_v3  ;;  %v703_v8 = vmax.f32 %v695_v5, 0.0  ;;  %v682_v9 = vmul.f32 %v2739_v7, %v2502_v55  ;;  %v651_v10 = vpop.f32.mrb[13].mxu1 }
 0x111   : > { %719 = vst.msk [vmem:[#allocation3 + $0x8] sm:$0xff] %vm708_vm1, %v700_v3  ;;  %v702_v11 = vmax.f32 %v694_v6, 0.0  ;;  %v681_v12 = vmul.f32 %v2502_v55, %v651_v10  ;;  %v1897_v0 = vld [vmem:[#allocation3 + $0x48] sm:$0xff] }
 0x112   : > { %722 = vst.msk [vmem:[#allocation3 + $0x20] sm:$0xff] %vm708_vm1, %v703_v8  ;;  %v697_v13 = vadd.f32 %v2503_v57, %v682_v9 }
 0x113   : > { %732 = vst.msk [vmem:[#allocation2 + $0x21] sm:$0x7f] %vm728_vm3, %v703_v8  ;;  %731 = vst.msk [vmem:[#allocation2 + $0x19] sm:$0x7f] %vm728_vm3, %v702_v11  ;;  %v696_v14 = vadd.f32 %v2503_v57, %v681_v12  ;;  %v2742_v15 = vpop.f32.mrb[14].mxu1 }
 0x114   : > { %751 = vst.msk [vmem:[#allocation4 + $0x1f] sm:$0xfe] %vm747_vm4, %v703_v8  ;;  %750 = vst.msk [vmem:[#allocation4 + $0x17] sm:$0xfe] %vm747_vm4, %v702_v11  ;;  %v705_v16 = vmax.f32 %v697_v13, 0.0  ;;  %v684_v17 = vmul.f32 %v2742_v15, %v2502_v55  ;;  %v661_v18 = vpop.f32.mrb[15].mxu1 }
 0x115   : > { %721 = vst.msk [vmem:[#allocation3 + $0x18] sm:$0xff] %vm708_vm1, %v702_v11  ;;  %v704_v19 = vmax.f32 %v696_v14, 0.0  ;;  %v683_v20 = vmul.f32 %v2502_v55, %v661_v18  ;;  %v3248_v27 = vld [vmem:[#allocation3 + $0x10] sm:$0xff] }
 0x116   : > { %724 = vst.msk [vmem:[#allocation3 + $0x30] sm:$0xff] %vm708_vm1, %v705_v16  ;;  %v699_v21 = vadd.f32 %v2503_v57, %v684_v17  ;;  %v765_v22 = vld [vmem:[#allocation2 + $0x8] sm:$0xff]  ;;  %v3246_v26 = vld [vmem:[#allocation2 + $0x10] sm:$0xff] }
 0x117   : > { %734 = vst.msk [vmem:[#allocation2 + $0x31] sm:$0x7f] %vm728_vm3, %v705_v16  ;;  %733 = vst.msk [vmem:[#allocation2 + $0x29] sm:$0x7f] %vm728_vm3, %v704_v19  ;;  %v698_v25 = vadd.f32 %v2503_v57, %v683_v20  ;;  %2746 = vmatmul.mubr.msk.f32.vlgmr.msra.gmra.mrb[0].mxu0 %vm708_vm1, %v765_v22  ;;  %v1074_v42 = vld [vmem:[#allocation4 + $0x8] sm:$0xff]  ;;  %v3310_v43 = vld [vmem:[#allocation4 + $0x10] sm:$0xff] }
 0x118   : > { %753 = vst.msk [vmem:[#allocation4 + $0x2f] sm:$0xfe] %vm747_vm4, %v705_v16  ;;  %v3235_v23 = vld [vmem:[#allocation3 + $0x8] sm:$0xff]  ;;  %752 = vst.msk [vmem:[#allocation4 + $0x27] sm:$0xfe] %vm747_vm4, %v704_v19  ;;  %v707_v29 = vmax.f32 %v699_v21, 0.0  ;;  %2748 = vmatprep.mubr.msk.f32.mxu0 %vm708_vm1, %v3246_v26  ;;  %2772 = vmatpush3.msra.mxu0 %v3189_v45 }
 0x119   : > { %723 = vst.msk [vmem:[#allocation3 + $0x28] sm:$0xff] %vm708_vm1, %v704_v19  ;;  %2760 = vmatmul.mubr.msk.f32.vlgmr.msra.gmra.mrb[16].mxu1 %vm708_vm1, %v3235_v23  ;;  %v706_v30 = vmax.f32 %v698_v25, 0.0  ;;  %2799 = vmatprep.subr.mxu0 %v2539_v24  ;;  %v3275_v34 = vld [vmem:[#allocation3 + $0x20] sm:$0xff]  ;;  %v2566_v45 = vld [vmem:[%s3570_s7 + $0x38] sm:$0xff] }
 0x11a   : > { %2762 = vmatprep.mubr.msk.f32.mxu1 %vm708_vm1, %v3248_v27  ;;  %2786 = vmatpush3.msra.mxu1 %v3195_v46  ;;  %726 = vst.msk [vmem:[#allocation3 + $0x40] sm:$0xff] %vm708_vm1, %v707_v29  ;;  %v3262_v31 = vld [vmem:[#allocation2 + $0x18] sm:$0xff]  ;;  %v3273_v33 = vld [vmem:[#allocation2 + $0x20] sm:$0xff] }
 0x11b   : > { %736 = vst.msk [vmem:[#allocation2 + $0x41] sm:$0x7f] %vm728_vm3, %v707_v29  ;;  %2813 = vmatprep.subr.mxu1 %v2548_v28  ;;  %735 = vst.msk [vmem:[#allocation2 + $0x39] sm:$0x7f] %vm728_vm3, %v706_v30  ;;  %2749 = vmatmul.mubr.msk.f32.gmra.mrb[2].mxu0 %vm708_vm1, %v3262_v31  ;;  %v1076_v46 = vld [vmem:[#allocation4 + $0x18] sm:$0xff]  ;;  %v1077_v55 = vld [vmem:[#allocation4 + $0x20] sm:$0xff] }
 0x11c   : > { %755 = vst.msk [vmem:[#allocation4 + $0x3f] sm:$0xfe] %vm747_vm4, %v707_v29  ;;  %v3264_v32 = vld [vmem:[#allocation3 + $0x18] sm:$0xff]  ;;  %754 = vst.msk [vmem:[#allocation4 + $0x37] sm:$0xfe] %vm747_vm4, %v706_v30  ;;  %2751 = vmatprep.mubr.msk.f32.mxu0 %vm708_vm1, %v3273_v33 }
 0x11d   : > { %725 = vst.msk [vmem:[#allocation3 + $0x38] sm:$0xff] %vm708_vm1, %v706_v30  ;;  %2763 = vmatmul.mubr.msk.f32.gmra.mrb[18].mxu1 %vm708_vm1, %v3264_v32  ;;  %v3291_v38 = vld [vmem:[#allocation3 + $0x30] sm:$0xff] }
 0x11e   : > { %2765 = vmatprep.mubr.msk.f32.mxu1 %vm708_vm1, %v3275_v34  ;;  %v3281_v35 = vld [vmem:[#allocation2 + $0x28] sm:$0xff]  ;;  %v3289_v37 = vld [vmem:[#allocation2 + $0x30] sm:$0xff] }
 0x11f   : > { %2752 = vmatmul.mubr.msk.f32.gmra.mrb[4].mxu0 %vm708_vm1, %v3281_v35  ;;  %v1078_v56 = vld [vmem:[#allocation4 + $0x28] sm:$0xff]  ;;  %v1079_v57 = vld [vmem:[#allocation4 + $0x30] sm:$0xff] }
 0x120   : > { %v3283_v36 = vld [vmem:[#allocation3 + $0x28] sm:$0xff]  ;;  %2754 = vmatprep.mubr.msk.f32.mxu0 %vm708_vm1, %v3289_v37 }
 0x121   : > { %2766 = vmatmul.mubr.msk.f32.gmra.mrb[20].mxu1 %vm708_vm1, %v3283_v36  ;;  %v1406_v61 = vld [vmem:[#allocation3 + $0x40] sm:$0xff] }
 0x122   : > { %2768 = vmatprep.mubr.msk.f32.mxu1 %vm708_vm1, %v3291_v38  ;;  %v3297_v40 = vld [vmem:[#allocation2 + $0x38] sm:$0xff]  ;;  %v1243_v59 = vld [vmem:[#allocation2 + $0x40] sm:$0xff] }
 0x123   : > { %2755 = vmatmul.mubr.msk.f32.gmra.mrb[6].mxu0 %vm708_vm1, %v3297_v40  ;;  %v1080_v58 = vld [vmem:[#allocation4 + $0x38] sm:$0xff]  ;;  %v1569_v62 = vld [vmem:[#allocation4 + $0x40] sm:$0xff] }
 0x124   : > { %v3299_v41 = vld [vmem:[#allocation3 + $0x38] sm:$0xff]  ;;  %2773 = vmatprep.mubr.msk.f32.mxu0 %vm708_vm1, %v1073_v39 }
 0x125   : > { %2769 = vmatmul.mubr.msk.f32.gmra.mrb[22].mxu1 %vm708_vm1, %v3299_v41 }
 0x126   : > { %2787 = vmatprep.mubr.msk.f32.mxu1 %vm708_vm1, %v765_v22 }
 0x127   : > { %2774 = vmatmul.mubr.msk.f32.vlgmr.msra.gmra.mrb[8].mxu0 %vm708_vm1, %v1074_v42 }
 0x128   : > { %2776 = vmatprep.mubr.msk.f32.mxu0 %vm708_vm1, %v3310_v43  ;;  %2800 = vmatpush3.msra.mxu0 %v2539_v24 }
 0x129   : > { %2788 = vmatmul.mubr.msk.f32.vlgmr.msra.gmra.mrb[24].mxu1 %vm708_vm1, %v3246_v26  ;;  %2827 = vmatprep.subr.mxu0 %v2557_v44 }
 0x12a   : > { %2790 = vmatprep.mubr.msk.f32.mxu1 %vm708_vm1, %v3262_v31  ;;  %2814 = vmatpush3.msra.mxu1 %v2548_v28 }
 0x12b   : > { %2841 = vmatprep.subr.mxu1 %v2566_v45  ;;  %2777 = vmatmul.mubr.msk.f32.gmra.mrb[10].mxu0 %vm708_vm1, %v1076_v46 }
 0x12c   : > { %2779 = vmatprep.mubr.msk.f32.mxu0 %vm708_vm1, %v1077_v55 }
 0x12d   : > { %2791 = vmatmul.mubr.msk.f32.gmra.mrb[26].mxu1 %vm708_vm1, %v3273_v33 }
 0x12e   : > { %2793 = vmatprep.mubr.msk.f32.mxu1 %vm708_vm1, %v3281_v35 }
 0x12f   : > { %2780 = vmatmul.mubr.msk.f32.gmra.mrb[12].mxu0 %vm708_vm1, %v1078_v56 }
 0x130   : > { %2782 = vmatprep.mubr.msk.f32.mxu0 %vm708_vm1, %v1079_v57 }
 0x131   : > { %2794 = vmatmul.mubr.msk.f32.gmra.mrb[28].mxu1 %vm708_vm1, %v3289_v37 }
 0x132   : > { %2796 = vmatprep.mubr.msk.f32.mxu1 %vm708_vm1, %v3297_v40 }
 0x133   : > { %2783 = vmatmul.mubr.msk.f32.gmra.mrb[14].mxu0 %vm708_vm1, %v1080_v58 }
 0x134   : > { %2801 = vmatprep.mubr.msk.f32.mxu0 %vm708_vm1, %v3235_v23 }
 0x135   : > { %2797 = vmatmul.mubr.msk.f32.gmra.mrb[30].mxu1 %vm708_vm1, %v1243_v59 }
 0x136   : > { %2815 = vmatprep.mubr.msk.f32.mxu1 %vm708_vm1, %v1074_v42 }
 0x137   : > { %2802 = vmatmul.mubr.msk.f32.vlgmr.msra.gmra.mrb[16].mxu0 %vm708_vm1, %v3248_v27 }
 0x138   : > { %2804 = vmatprep.mubr.msk.f32.mxu0 %vm708_vm1, %v3264_v32  ;;  %2828 = vmatpush3.msra.mxu0 %v2557_v44 }
 0x139   : > { %2816 = vmatmul.mubr.msk.f32.vlgmr.msra.gmra.mrb[32].mxu1 %vm708_vm1, %v3310_v43  ;;  %2855 = vmatprep.subr.mxu0 %v2575_v60 }
 0x13a   : > { %2818 = vmatprep.mubr.msk.f32.mxu1 %vm708_vm1, %v1076_v46  ;;  %2842 = vmatpush3.msra.mxu1 %v2566_v45 }
 0x13b   : > { %2805 = vmatmul.mubr.msk.f32.gmra.mrb[18].mxu0 %vm708_vm1, %v3275_v34 }
 0x13c   : > { %2807 = vmatprep.mubr.msk.f32.mxu0 %vm708_vm1, %v3283_v36 }
 0x13d   : > { %2819 = vmatmul.mubr.msk.f32.gmra.mrb[34].mxu1 %vm708_vm1, %v1077_v55 }
 0x13e   : > { %2821 = vmatprep.mubr.msk.f32.mxu1 %vm708_vm1, %v1078_v56 }
 0x13f   : > { %2808 = vmatmul.mubr.msk.f32.gmra.mrb[20].mxu0 %vm708_vm1, %v3291_v38 }
 0x140   : > { %2810 = vmatprep.mubr.msk.f32.mxu0 %vm708_vm1, %v3299_v41 }
 0x141   : > { %2822 = vmatmul.mubr.msk.f32.gmra.mrb[36].mxu1 %vm708_vm1, %v1079_v57 }
 0x142   : > { %2824 = vmatprep.mubr.msk.f32.mxu1 %vm708_vm1, %v1080_v58 }
 0x143   : > { %2811 = vmatmul.mubr.msk.f32.gmra.mrb[22].mxu0 %vm708_vm1, %v1406_v61 }
 0x144   : > { %2829 = vmatprep.mubr.msk.f32.mxu0 %vm708_vm1, %v3246_v26 }
 0x145   : > { %2825 = vmatmul.mubr.msk.f32.gmra.mrb[38].mxu1 %vm708_vm1, %v1569_v62 }
 0x146   : > { %2843 = vmatprep.mubr.msk.f32.mxu1 %vm708_vm1, %v3248_v27 }
 0x147   : > { %2830 = vmatmul.mubr.msk.f32.vlgmr.msra.gmra.mrb[24].mxu0 %vm708_vm1, %v3262_v31 }
 0x148   : > { %2832 = vmatprep.mubr.msk.f32.mxu0 %vm708_vm1, %v3273_v33  ;;  %2856 = vmatpush3.msra.mxu0 %v2575_v60 }
 0x149   : > { %2844 = vmatmul.mubr.msk.f32.vlgmr.msra.gmra.mrb[40].mxu1 %vm708_vm1, %v3264_v32  ;;  %2869 = vmatprep.subr.mxu0 %v2263_v2 }
 0x14a   : > { %2846 = vmatprep.mubr.msk.f32.mxu1 %vm708_vm1, %v3275_v34 }
 0x14b   : > { %2833 = vmatmul.mubr.msk.f32.gmra.mrb[26].mxu0 %vm708_vm1, %v3281_v35 }
 0x14c   : > { %2835 = vmatprep.mubr.msk.f32.mxu0 %vm708_vm1, %v3289_v37 }
 0x14d   : > { %2847 = vmatmul.mubr.msk.f32.gmra.mrb[42].mxu1 %vm708_vm1, %v3283_v36 }
 0x14e   : > { %2849 = vmatprep.mubr.msk.f32.mxu1 %vm708_vm1, %v3291_v38 }
 0x14f   : > { %2836 = vmatmul.mubr.msk.f32.gmra.mrb[28].mxu0 %vm708_vm1, %v3297_v40 }
 0x150   : > { %2838 = vmatprep.mubr.msk.f32.mxu0 %vm708_vm1, %v1243_v59 }
 0x151   : > { %2850 = vmatmul.mubr.msk.f32.gmra.mrb[44].mxu1 %vm708_vm1, %v3299_v41 }
 0x152   : > { %2852 = vmatprep.mubr.msk.f32.mxu1 %vm708_vm1, %v1406_v61 }
 0x153   : > { %2839 = vmatmul.mubr.msk.f32.gmra.mrb[30].mxu0 %vm708_vm1, %v1733_v63 }
 0x154   : > { %2857 = vmatprep.mubr.msk.f32.mxu0 %vm708_vm1, %v3310_v43 }
 0x155   : > { %2853 = vmatmul.mubr.msk.f32.gmra.mrb[46].mxu1 %vm708_vm1, %v1897_v0 }
 0x157   : > { %2858 = vmatmul.mubr.msk.f32.vlgmr.msra.gmra.mrb[32].mxu0 %vm708_vm1, %v1076_v46 }
 0x158   : > { %2860 = vmatprep.mubr.msk.f32.mxu0 %vm708_vm1, %v1077_v55  ;;  %2870 = vmatpush3.msra.mxu0 %v2263_v2 }
 0x15b   : > { %2861 = vmatmul.mubr.msk.f32.gmra.mrb[34].mxu0 %vm708_vm1, %v1078_v56 }
 0x15c   : > { %2863 = vmatprep.mubr.msk.f32.mxu0 %vm708_vm1, %v1079_v57 }
 0x15f   : > { %2864 = vmatmul.mubr.msk.f32.gmra.mrb[36].mxu0 %vm708_vm1, %v1080_v58 }
 0x160   : > { %2866 = vmatprep.mubr.msk.f32.mxu0 %vm708_vm1, %v1569_v62 }
 0x163   : > { %2867 = vmatmul.mubr.msk.f32.gmra.mrb[38].mxu0 %vm708_vm1, %v2061_v1 }
 0x1ea   : > { %v2747_v3 = vpop.f32.mrb[0].mxu0 }
 0x1eb   : > { %903 = vst.msk [vmem:[#allocation5 + $0x8] sm:$0xff] %vm708_vm1, %v2747_v3  ;;  %v863_v5 = vpop.f32.mrb[1].mxu0 }
 0x1ec   : > { %v2761_v4 = vpop.f32.mrb[16].mxu1  ;;  %902 = vst.msk [vmem:[#allocation5] sm:$0xff] %vm708_vm1, %v863_v5 }
 0x1ed   : > { %v1010_v6 = vpop.f32.mrb[17].mxu1 }
 0x1ee   : > { %v2750_v7 = vpop.f32.mrb[2].mxu0 }
 0x1ef   : > { %905 = vst.msk [vmem:[#allocation5 + $0x18] sm:$0xff] %vm708_vm1, %v2750_v7  ;;  %v873_v9 = vpop.f32.mrb[3].mxu0 }
 0x1f0   : > { %v2764_v8 = vpop.f32.mrb[18].mxu1  ;;  %904 = vst.msk [vmem:[#allocation5 + $0x10] sm:$0xff] %vm708_vm1, %v873_v9 }
 0x1f1   : > { %v1020_v10 = vpop.f32.mrb[19].mxu1 }
 0x1f2   : > { %v1050_v11 = vld [vmem:[#allocation5 + $0x8] sm:$0xff]  ;;  %v2753_v12 = vpop.f32.mrb[4].mxu0 }
 0x1f3   : > { %v1058_v14 = vadd.f32 %v2761_v4, %v1050_v11  ;;  %v1049_v15 = vld [vmem:[#allocation5] sm:$0xff]  ;;  %907 = vst.msk [vmem:[#allocation5 + $0x28] sm:$0xff] %vm708_vm1, %v2753_v12  ;;  %v883_v16 = vpop.f32.mrb[5].mxu0 }
 0x1f4   : > { %v2767_v13 = vpop.f32.mrb[20].mxu1  ;;  %v1057_v18 = vadd.f32 %v1049_v15, %v1010_v6  ;;  %906 = vst.msk [vmem:[#allocation5 + $0x20] sm:$0xff] %vm708_vm1, %v883_v16 }
 0x1f5   : > { %v1030_v17 = vpop.f32.mrb[21].mxu1  ;;  %1066 = vst.msk [vmem:[#allocation5 + $0x8] sm:$0xff] %vm708_vm1, %v1058_v14 }
 0x1f6   : > { %1065 = vst.msk [vmem:[#allocation5] sm:$0xff] %vm708_vm1, %v1057_v18  ;;  %v1052_v19 = vld [vmem:[#allocation5 + $0x18] sm:$0xff]  ;;  %v2756_v20 = vpop.f32.mrb[6].mxu0 }
 0x1f7   : > { %v1060_v22 = vadd.f32 %v2764_v8, %v1052_v19  ;;  %v1051_v23 = vld [vmem:[#allocation5 + $0x10] sm:$0xff]  ;;  %909 = vst.msk [vmem:[#allocation5 + $0x38] sm:$0xff] %vm708_vm1, %v2756_v20  ;;  %v893_v24 = vpop.f32.mrb[7].mxu0 }
 0x1f8   : > { %v2770_v21 = vpop.f32.mrb[22].mxu1  ;;  %v1059_v26 = vadd.f32 %v1051_v23, %v1020_v10  ;;  %908 = vst.msk [vmem:[#allocation5 + $0x30] sm:$0xff] %vm708_vm1, %v893_v24 }
 0x1f9   : > { %v1040_v25 = vpop.f32.mrb[23].mxu1  ;;  %1068 = vst.msk [vmem:[#allocation5 + $0x18] sm:$0xff] %vm708_vm1, %v1060_v22 }
 0x1fa   : > { %1067 = vst.msk [vmem:[#allocation5 + $0x10] sm:$0xff] %vm708_vm1, %v1059_v26  ;;  %v1054_v27 = vld [vmem:[#allocation5 + $0x28] sm:$0xff]  ;;  %v2775_v28 = vpop.f32.mrb[8].mxu0 }
 0x1fb   : > { %v1062_v30 = vadd.f32 %v2767_v13, %v1054_v27  ;;  %v1053_v31 = vld [vmem:[#allocation5 + $0x20] sm:$0xff]  ;;  %v1173_v32 = vpop.f32.mrb[9].mxu0 }
 0x1fc   : > { %v2789_v29 = vpop.f32.mrb[24].mxu1  ;;  %v1061_v34 = vadd.f32 %v1053_v31, %v1030_v17  ;;  %v1213_v35 = vld [vmem:[#allocation5 + $0x8] sm:$0xff] }
 0x1fd   : > { %v1336_v33 = vpop.f32.mrb[25].mxu1  ;;  %1070 = vst.msk [vmem:[#allocation5 + $0x28] sm:$0xff] %vm708_vm1, %v1062_v30  ;;  %v1221_v36 = vadd.f32 %v2775_v28, %v1213_v35  ;;  %v1212_v37 = vld [vmem:[#allocation5] sm:$0xff] }
 0x1fe   : > { %1069 = vst.msk [vmem:[#allocation5 + $0x20] sm:$0xff] %vm708_vm1, %v1061_v34  ;;  %v1056_v38 = vld [vmem:[#allocation5 + $0x38] sm:$0xff]  ;;  %v1220_v39 = vadd.f32 %v1212_v37, %v1173_v32  ;;  %v2778_v40 = vpop.f32.mrb[10].mxu0 }
 0x1ff   : > { %v1064_v42 = vadd.f32 %v2770_v21, %v1056_v38  ;;  %v1055_v43 = vld [vmem:[#allocation5 + $0x30] sm:$0xff]  ;;  %1229 = vst.msk [vmem:[#allocation5 + $0x8] sm:$0xff] %vm708_vm1, %v1221_v36  ;;  %v1183_v44 = vpop.f32.mrb[11].mxu0 }
 0x200   : > { %v2792_v41 = vpop.f32.mrb[26].mxu1  ;;  %v1063_v46 = vadd.f32 %v1055_v43, %v1040_v25  ;;  %1228 = vst.msk [vmem:[#allocation5] sm:$0xff] %vm708_vm1, %v1220_v39  ;;  %v1215_v55 = vld [vmem:[#allocation5 + $0x18] sm:$0xff] }
 0x201   : > { %v1346_v45 = vpop.f32.mrb[27].mxu1  ;;  %1072 = vst.msk [vmem:[#allocation5 + $0x38] sm:$0xff] %vm708_vm1, %v1064_v42  ;;  %v1223_v56 = vadd.f32 %v2778_v40, %v1215_v55  ;;  %v1214_v57 = vld [vmem:[#allocation5 + $0x10] sm:$0xff] }
 0x202   : > { %1071 = vst.msk [vmem:[#allocation5 + $0x30] sm:$0xff] %vm708_vm1, %v1063_v46  ;;  %v1222_v58 = vadd.f32 %v1214_v57, %v1183_v44  ;;  %v2781_v59 = vpop.f32.mrb[12].mxu0 }
 0x203   : > { %1231 = vst.msk [vmem:[#allocation5 + $0x18] sm:$0xff] %vm708_vm1, %v1223_v56  ;;  %v1193_v61 = vpop.f32.mrb[13].mxu0 }
 0x204   : > { %v2795_v60 = vpop.f32.mrb[28].mxu1  ;;  %1230 = vst.msk [vmem:[#allocation5 + $0x10] sm:$0xff] %vm708_vm1, %v1222_v58  ;;  %v1217_v63 = vld [vmem:[#allocation5 + $0x28] sm:$0xff] }
 0x205   : > { %v1356_v62 = vpop.f32.mrb[29].mxu1  ;;  %v1225_v0 = vadd.f32 %v2781_v59, %v1217_v63  ;;  %v1216_v1 = vld [vmem:[#allocation5 + $0x20] sm:$0xff] }
 0x206   : > { %v1376_v2 = vld [vmem:[#allocation5 + $0x8] sm:$0xff]  ;;  %v1224_v3 = vadd.f32 %v1216_v1, %v1193_v61  ;;  %v2784_v4 = vpop.f32.mrb[14].mxu0 }
 0x207   : > { %v1384_v6 = vadd.f32 %v2789_v29, %v1376_v2  ;;  %v1375_v7 = vld [vmem:[#allocation5] sm:$0xff]  ;;  %1233 = vst.msk [vmem:[#allocation5 + $0x28] sm:$0xff] %vm708_vm1, %v1225_v0  ;;  %v1203_v8 = vpop.f32.mrb[15].mxu0 }
 0x208   : > { %v2798_v5 = vpop.f32.mrb[30].mxu1  ;;  %v1383_v10 = vadd.f32 %v1375_v7, %v1336_v33  ;;  %1232 = vst.msk [vmem:[#allocation5 + $0x20] sm:$0xff] %vm708_vm1, %v1224_v3  ;;  %v1219_v11 = vld [vmem:[#allocation5 + $0x38] sm:$0xff] }
 0x209   : > { %v1366_v9 = vpop.f32.mrb[31].mxu1  ;;  %1392 = vst.msk [vmem:[#allocation5 + $0x8] sm:$0xff] %vm708_vm1, %v1384_v6  ;;  %v1227_v12 = vadd.f32 %v2784_v4, %v1219_v11  ;;  %v1218_v13 = vld [vmem:[#allocation5 + $0x30] sm:$0xff] }
 0x20a   : > { %1391 = vst.msk [vmem:[#allocation5] sm:$0xff] %vm708_vm1, %v1383_v10  ;;  %v1378_v14 = vld [vmem:[#allocation5 + $0x18] sm:$0xff]  ;;  %v1226_v15 = vadd.f32 %v1218_v13, %v1203_v8  ;;  %v2803_v16 = vpop.f32.mrb[16].mxu0 }
 0x20b   : > { %v1386_v18 = vadd.f32 %v2792_v41, %v1378_v14  ;;  %v1377_v19 = vld [vmem:[#allocation5 + $0x10] sm:$0xff]  ;;  %1235 = vst.msk [vmem:[#allocation5 + $0x38] sm:$0xff] %vm708_vm1, %v1227_v12  ;;  %v1499_v20 = vpop.f32.mrb[17].mxu0 }
 0x20c   : > { %v2817_v17 = vpop.f32.mrb[32].mxu1  ;;  %v1385_v22 = vadd.f32 %v1377_v19, %v1346_v45  ;;  %1234 = vst.msk [vmem:[#allocation5 + $0x30] sm:$0xff] %vm708_vm1, %v1226_v15 }
 0x20d   : > { %v1662_v21 = vpop.f32.mrb[33].mxu1  ;;  %1394 = vst.msk [vmem:[#allocation5 + $0x18] sm:$0xff] %vm708_vm1, %v1386_v18 }
 0x20e   : > { %1393 = vst.msk [vmem:[#allocation5 + $0x10] sm:$0xff] %vm708_vm1, %v1385_v22  ;;  %v1380_v23 = vld [vmem:[#allocation5 + $0x28] sm:$0xff]  ;;  %v2806_v24 = vpop.f32.mrb[18].mxu0 }
 0x20f   : > { %v1388_v26 = vadd.f32 %v2795_v60, %v1380_v23  ;;  %v1379_v27 = vld [vmem:[#allocation5 + $0x20] sm:$0xff]  ;;  %v1509_v28 = vpop.f32.mrb[19].mxu0 }
 0x210   : > { %v2820_v25 = vpop.f32.mrb[34].mxu1  ;;  %v1387_v30 = vadd.f32 %v1379_v27, %v1356_v62  ;;  %v1539_v31 = vld [vmem:[#allocation5 + $0x8] sm:$0xff] }
 0x211   : > { %v1672_v29 = vpop.f32.mrb[35].mxu1  ;;  %1396 = vst.msk [vmem:[#allocation5 + $0x28] sm:$0xff] %vm708_vm1, %v1388_v26  ;;  %v1547_v32 = vadd.f32 %v2803_v16, %v1539_v31  ;;  %v1538_v33 = vld [vmem:[#allocation5] sm:$0xff] }
 0x212   : > { %1395 = vst.msk [vmem:[#allocation5 + $0x20] sm:$0xff] %vm708_vm1, %v1387_v30  ;;  %v1382_v34 = vld [vmem:[#allocation5 + $0x38] sm:$0xff]  ;;  %v1546_v35 = vadd.f32 %v1538_v33, %v1499_v20  ;;  %v2809_v36 = vpop.f32.mrb[20].mxu0 }
 0x213   : > { %v1390_v38 = vadd.f32 %v2798_v5, %v1382_v34  ;;  %v1381_v39 = vld [vmem:[#allocation5 + $0x30] sm:$0xff]  ;;  %1555 = vst.msk [vmem:[#allocation5 + $0x8] sm:$0xff] %vm708_vm1, %v1547_v32  ;;  %v1519_v40 = vpop.f32.mrb[21].mxu0 }
 0x214   : > { %v2823_v37 = vpop.f32.mrb[36].mxu1  ;;  %v1389_v42 = vadd.f32 %v1381_v39, %v1366_v9  ;;  %1554 = vst.msk [vmem:[#allocation5] sm:$0xff] %vm708_vm1, %v1546_v35  ;;  %v1541_v43 = vld [vmem:[#allocation5 + $0x18] sm:$0xff] }
 0x215   : > { %v1682_v41 = vpop.f32.mrb[37].mxu1  ;;  %1398 = vst.msk [vmem:[#allocation5 + $0x38] sm:$0xff] %vm708_vm1, %v1390_v38  ;;  %v1549_v44 = vadd.f32 %v2806_v24, %v1541_v43  ;;  %v1540_v45 = vld [vmem:[#allocation5 + $0x10] sm:$0xff] }
 0x216   : > { %1397 = vst.msk [vmem:[#allocation5 + $0x30] sm:$0xff] %vm708_vm1, %v1389_v42  ;;  %v1548_v46 = vadd.f32 %v1540_v45, %v1509_v28  ;;  %v2812_v55 = vpop.f32.mrb[22].mxu0 }
 0x217   : > { %1557 = vst.msk [vmem:[#allocation5 + $0x18] sm:$0xff] %vm708_vm1, %v1549_v44  ;;  %v1529_v57 = vpop.f32.mrb[23].mxu0 }
 0x218   : > { %v2826_v56 = vpop.f32.mrb[38].mxu1  ;;  %1556 = vst.msk [vmem:[#allocation5 + $0x10] sm:$0xff] %vm708_vm1, %v1548_v46  ;;  %v1543_v59 = vld [vmem:[#allocation5 + $0x28] sm:$0xff] }
 0x219   : > { %v1692_v58 = vpop.f32.mrb[39].mxu1  ;;  %v1551_v60 = vadd.f32 %v2809_v36, %v1543_v59  ;;  %v1542_v61 = vld [vmem:[#allocation5 + $0x20] sm:$0xff] }
 0x21a   : > { %v1702_v62 = vld [vmem:[#allocation5 + $0x8] sm:$0xff]  ;;  %v1550_v63 = vadd.f32 %v1542_v61, %v1519_v40  ;;  %v2831_v0 = vpop.f32.mrb[24].mxu0 }
 0x21b   : > { %v1710_v2 = vadd.f32 %v2817_v17, %v1702_v62  ;;  %v1701_v3 = vld [vmem:[#allocation5] sm:$0xff]  ;;  %1559 = vst.msk [vmem:[#allocation5 + $0x28] sm:$0xff] %vm708_vm1, %v1551_v60  ;;  %v1826_v4 = vpop.f32.mrb[25].mxu0 }
 0x21c   : > { %v3439_v1 = vpop.f32.mrb[40].mxu1  ;;  %v1709_v6 = vadd.f32 %v1701_v3, %v1662_v21  ;;  %1558 = vst.msk [vmem:[#allocation5 + $0x20] sm:$0xff] %vm708_vm1, %v1550_v63  ;;  %v1545_v7 = vld [vmem:[#allocation5 + $0x38] sm:$0xff] }
 0x21d   : > { %v3442_v5 = vpop.f32.mrb[41].mxu1  ;;  %1718 = vst.msk [vmem:[#allocation5 + $0x8] sm:$0xff] %vm708_vm1, %v1710_v2  ;;  %v1553_v8 = vadd.f32 %v2812_v55, %v1545_v7  ;;  %v1544_v9 = vld [vmem:[#allocation5 + $0x30] sm:$0xff] }
 0x21e   : > { %1717 = vst.msk [vmem:[#allocation5] sm:$0xff] %vm708_vm1, %v1709_v6  ;;  %v1704_v10 = vld [vmem:[#allocation5 + $0x18] sm:$0xff]  ;;  %v1552_v11 = vadd.f32 %v1544_v9, %v1529_v57  ;;  %v2834_v12 = vpop.f32.mrb[26].mxu0 }
 0x21f   : > { %v1712_v14 = vadd.f32 %v2820_v25, %v1704_v10  ;;  %v1703_v15 = vld [vmem:[#allocation5 + $0x10] sm:$0xff]  ;;  %1561 = vst.msk [vmem:[#allocation5 + $0x38] sm:$0xff] %vm708_vm1, %v1553_v8  ;;  %v1836_v16 = vpop.f32.mrb[27].mxu0 }
 0x220   : > { %v3447_v13 = vpop.f32.mrb[42].mxu1  ;;  %v1711_v18 = vadd.f32 %v1703_v15, %v1672_v29  ;;  %1560 = vst.msk [vmem:[#allocation5 + $0x30] sm:$0xff] %vm708_vm1, %v1552_v11 }
 0x221   : > { %v3450_v17 = vpop.f32.mrb[43].mxu1  ;;  %1720 = vst.msk [vmem:[#allocation5 + $0x18] sm:$0xff] %vm708_vm1, %v1712_v14 }
 0x222   : > { %1719 = vst.msk [vmem:[#allocation5 + $0x10] sm:$0xff] %vm708_vm1, %v1711_v18  ;;  %v1706_v19 = vld [vmem:[#allocation5 + $0x28] sm:$0xff]  ;;  %v2837_v20 = vpop.f32.mrb[28].mxu0 }
 0x223   : > { %v1714_v22 = vadd.f32 %v2823_v37, %v1706_v19  ;;  %v1705_v23 = vld [vmem:[#allocation5 + $0x20] sm:$0xff]  ;;  %v1846_v24 = vpop.f32.mrb[29].mxu0 }
 0x224   : > { %v2851_v21 = vpop.f32.mrb[44].mxu1  ;;  %v1713_v26 = vadd.f32 %v1705_v23, %v1682_v41  ;;  %v1866_v27 = vld [vmem:[#allocation5 + $0x8] sm:$0xff] }
 0x225   : > { %v2010_v25 = vpop.f32.mrb[45].mxu1  ;;  %1722 = vst.msk [vmem:[#allocation5 + $0x28] sm:$0xff] %vm708_vm1, %v1714_v22  ;;  %v1874_v28 = vadd.f32 %v2831_v0, %v1866_v27  ;;  %v1865_v30 = vld [vmem:[#allocation5] sm:$0xff] }
 0x226   : > { %1721 = vst.msk [vmem:[#allocation5 + $0x20] sm:$0xff] %vm708_vm1, %v1713_v26  ;;  %v1708_v29 = vld [vmem:[#allocation5 + $0x38] sm:$0xff]  ;;  %v1873_v31 = vadd.f32 %v1865_v30, %v1826_v4  ;;  %v2840_v32 = vpop.f32.mrb[30].mxu0 }
 0x227   : > { %v1716_v34 = vadd.f32 %v2826_v56, %v1708_v29  ;;  %v1707_v35 = vld [vmem:[#allocation5 + $0x30] sm:$0xff]  ;;  %1882 = vst.msk [vmem:[#allocation5 + $0x8] sm:$0xff] %vm708_vm1, %v1874_v28  ;;  %v1856_v36 = vpop.f32.mrb[31].mxu0 }
 0x228   : > { %v2854_v33 = vpop.f32.mrb[46].mxu1  ;;  %v1715_v38 = vadd.f32 %v1707_v35, %v1692_v58  ;;  %1881 = vst.msk [vmem:[#allocation5] sm:$0xff] %vm708_vm1, %v1873_v31  ;;  %v1868_v39 = vld [vmem:[#allocation5 + $0x18] sm:$0xff]  ;;  %v2584_v28 = vld [vmem:[%s3567_s4] ss:$0 sm:$0xff] }
 0x229   : > { %v2020_v37 = vpop.f32.mrb[47].mxu1  ;;  %1724 = vst.msk [vmem:[#allocation5 + $0x38] sm:$0xff] %vm708_vm1, %v1716_v34  ;;  %v1876_v40 = vadd.f32 %v2834_v12, %v1868_v39  ;;  %v1867_v41 = vld [vmem:[#allocation5 + $0x10] sm:$0xff] }
 0x22a   : > { %1723 = vst.msk [vmem:[#allocation5 + $0x30] sm:$0xff] %vm708_vm1, %v1715_v38  ;;  %v1875_v42 = vadd.f32 %v1867_v41, %v1836_v16  ;;  %v2859_v43 = vpop.f32.mrb[32].mxu0 }
 0x22b   : > { %1884 = vst.msk [vmem:[#allocation5 + $0x18] sm:$0xff] %vm708_vm1, %v1876_v40  ;;  %v2154_v44 = vpop.f32.mrb[33].mxu0 }
 0x22c   : > { %1883 = vst.msk [vmem:[#allocation5 + $0x10] sm:$0xff] %vm708_vm1, %v1875_v42  ;;  %v1870_v45 = vld [vmem:[#allocation5 + $0x28] sm:$0xff] }
 0x22d   : > { %v1878_v46 = vadd.f32 %v2837_v20, %v1870_v45  ;;  %v1869_v55 = vld [vmem:[#allocation5 + $0x20] sm:$0xff] }
 0x22e   : > { %v2030_v56 = vld [vmem:[#allocation5 + $0x8] sm:$0xff]  ;;  %v1877_v57 = vadd.f32 %v1869_v55, %v1846_v24  ;;  %v2862_v58 = vpop.f32.mrb[34].mxu0 }
 0x22f   : > { %v2038_v59 = vadd.f32 %v3439_v1, %v2030_v56  ;;  %v2029_v60 = vld [vmem:[#allocation5] sm:$0xff]  ;;  %1886 = vst.msk [vmem:[#allocation5 + $0x28] sm:$0xff] %vm708_vm1, %v1878_v46  ;;  %v2164_v61 = vpop.f32.mrb[35].mxu0 }
 0x230   : > { %v2037_v62 = vadd.f32 %v2029_v60, %v3442_v5  ;;  %1885 = vst.msk [vmem:[#allocation5 + $0x20] sm:$0xff] %vm708_vm1, %v1877_v57  ;;  %v1872_v63 = vld [vmem:[#allocation5 + $0x38] sm:$0xff] }
 0x231   : > { %2046 = vst.msk [vmem:[#allocation5 + $0x8] sm:$0xff] %vm708_vm1, %v2038_v59  ;;  %v1880_v0 = vadd.f32 %v2840_v32, %v1872_v63  ;;  %v1871_v2 = vld [vmem:[#allocation5 + $0x30] sm:$0xff] }
 0x232   : > { %2045 = vst.msk [vmem:[#allocation5] sm:$0xff] %vm708_vm1, %v2037_v62  ;;  %v2032_v3 = vld [vmem:[#allocation5 + $0x18] sm:$0xff]  ;;  %v1879_v4 = vadd.f32 %v1871_v2, %v1856_v36  ;;  %v2865_v6 = vpop.f32.mrb[36].mxu0  ;;  %v2585_v32 = vld [vmem:[%s3568_s5] ss:$0 sm:$0xff] }
 0x233   : > { %v2040_v1 = vadd.f32 %v3447_v13, %v2032_v3  ;;  %v2031_v7 = vld [vmem:[#allocation5 + $0x10] sm:$0xff]  ;;  %1888 = vst.msk [vmem:[#allocation5 + $0x38] sm:$0xff] %vm708_vm1, %v1880_v0  ;;  %v2174_v8 = vpop.f32.mrb[37].mxu0 }
 0x234   : > { %v2039_v5 = vadd.f32 %v2031_v7, %v3450_v17  ;;  %1887 = vst.msk [vmem:[#allocation5 + $0x30] sm:$0xff] %vm708_vm1, %v1879_v4 }
 0x235   : > { %2048 = vst.msk [vmem:[#allocation5 + $0x18] sm:$0xff] %vm708_vm1, %v2040_v1 }
 0x236   : > { %2047 = vst.msk [vmem:[#allocation5 + $0x10] sm:$0xff] %vm708_vm1, %v2039_v5  ;;  %v2034_v9 = vld [vmem:[#allocation5 + $0x28] sm:$0xff]  ;;  %v2868_v10 = vpop.f32.mrb[38].mxu0 }
 0x237   : > { %v2042_v11 = vadd.f32 %v2851_v21, %v2034_v9  ;;  %v2033_v12 = vld [vmem:[#allocation5 + $0x20] sm:$0xff]  ;;  %v2184_v14 = vpop.f32.mrb[39].mxu0 }
 0x238   : > { %v2041_v15 = vadd.f32 %v2033_v12, %v2010_v25  ;;  %v2194_v16 = vld [vmem:[#allocation5 + $0x8] sm:$0xff] }
 0x239   : > { %2050 = vst.msk [vmem:[#allocation5 + $0x28] sm:$0xff] %vm708_vm1, %v2042_v11  ;;  %v2202_v13 = vadd.f32 %v2859_v43, %v2194_v16  ;;  %v2193_v18 = vld [vmem:[#allocation5] sm:$0xff] }
 0x23a   : > { %2049 = vst.msk [vmem:[#allocation5 + $0x20] sm:$0xff] %vm708_vm1, %v2041_v15  ;;  %v2201_v17 = vadd.f32 %v2193_v18, %v2154_v44  ;;  %v2036_v19 = vld [vmem:[#allocation5 + $0x38] sm:$0xff] }
 0x23b   : > { %2210 = vst.msk [vmem:[#allocation5 + $0x8] sm:$0xff] %vm708_vm1, %v2202_v13  ;;  %v2044_v20 = vadd.f32 %v2854_v33, %v2036_v19  ;;  %v2035_v22 = vld [vmem:[#allocation5 + $0x30] sm:$0xff] }
 0x23c   : > { %2209 = vst.msk [vmem:[#allocation5] sm:$0xff] %vm708_vm1, %v2201_v17  ;;  %v2196_v23 = vld [vmem:[#allocation5 + $0x18] sm:$0xff]  ;;  %v2043_v21 = vadd.f32 %v2035_v22, %v2020_v37 }
 0x23d   : > { %v2204_v24 = vadd.f32 %v2862_v58, %v2196_v23  ;;  %v2195_v26 = vld [vmem:[#allocation5 + $0x10] sm:$0xff]  ;;  %2052 = vst.msk [vmem:[#allocation5 + $0x38] sm:$0xff] %vm708_vm1, %v2044_v20 }
 0x23e   : > { %v2203_v25 = vadd.f32 %v2195_v26, %v2164_v61  ;;  %2051 = vst.msk [vmem:[#allocation5 + $0x30] sm:$0xff] %vm708_vm1, %v2043_v21 }
 0x23f   : > { %2212 = vst.msk [vmem:[#allocation5 + $0x18] sm:$0xff] %vm708_vm1, %v2204_v24 }
 0x240   : > { %2211 = vst.msk [vmem:[#allocation5 + $0x10] sm:$0xff] %vm708_vm1, %v2203_v25  ;;  %v2198_v27 = vld [vmem:[#allocation5 + $0x28] sm:$0xff] }
 0x241   : > { %v2206_v30 = vadd.f32 %v2865_v6, %v2198_v27  ;;  %v2197_v29 = vld [vmem:[#allocation5 + $0x20] sm:$0xff] }
 0x242   : > { %v2205_v31 = vadd.f32 %v2197_v29, %v2174_v8  ;;  %v2218_v33 = vld [vmem:[#allocation5 + $0x8] sm:$0xff] }
 0x243   : > { %2214 = vst.msk [vmem:[#allocation5 + $0x28] sm:$0xff] %vm708_vm1, %v2206_v30  ;;  %v2217_v34 = vld [vmem:[#allocation5] sm:$0xff]  ;;  %v2233_v35 = vmul.f32 %v2584_v28, %v2218_v33 }
 0x244   : > { %2213 = vst.msk [vmem:[#allocation5 + $0x20] sm:$0xff] %vm708_vm1, %v2205_v31  ;;  %v2200_v36 = vld [vmem:[#allocation5 + $0x38] sm:$0xff]  ;;  %v2232_v37 = vmul.f32 %v2584_v28, %v2217_v34 }
 0x245   : > { %v2208_v38 = vadd.f32 %v2868_v10, %v2200_v36  ;;  %v2199_v39 = vld [vmem:[#allocation5 + $0x30] sm:$0xff]  ;;  %v2248_v40 = vadd.f32 %v2585_v32, %v2233_v35 }
 0x246   : > { %v2207_v41 = vadd.f32 %v2199_v39, %v2184_v14  ;;  %v2247_v42 = vadd.f32 %v2585_v32, %v2232_v37  ;;  %v2220_v43 = vld [vmem:[#allocation5 + $0x18] sm:$0xff] }
 0x247   : > { %2216 = vst.msk [vmem:[#allocation5 + $0x38] sm:$0xff] %vm708_vm1, %v2208_v38  ;;  %v2219_v44 = vld [vmem:[#allocation5 + $0x10] sm:$0xff]  ;;  %v2235_v45 = vmul.f32 %v2584_v28, %v2220_v43  ;;  %v2256_v56 = vmax.f32 %v2248_v40, 0.0 }
 0x248   : > { %2215 = vst.msk [vmem:[#allocation5 + $0x30] sm:$0xff] %vm708_vm1, %v2207_v41  ;;  %v2255_v46 = vmax.f32 %v2247_v42, 0.0  ;;  %v2234_v55 = vmul.f32 %v2584_v28, %v2219_v44 }
 0x249   : > { %v2250_v57 = vadd.f32 %v2585_v32, %v2235_v45 }
 0x24a   : > { %2871 = vmatprep.mubr.msk.f32.mxu0 %vm708_vm1, %v2255_v46  ;;  %v2249_v58 = vadd.f32 %v2585_v32, %v2234_v55  ;;  %v2222_v59 = vld [vmem:[#allocation5 + $0x28] sm:$0xff] }
 0x24b   : > { %2872 = vmatmul.mubr.msk.f32.vlgmr.msra.gmra.mrb[40].mxu0 %vm708_vm1, %v2256_v56  ;;  %v2221_v60 = vld [vmem:[#allocation5 + $0x20] sm:$0xff]  ;;  %v2237_v61 = vmul.f32 %v2584_v28, %v2222_v59  ;;  %v2258_v0 = vmax.f32 %v2250_v57, 0.0 }
 0x24c   : > { %v2257_v62 = vmax.f32 %v2249_v58, 0.0  ;;  %v2236_v63 = vmul.f32 %v2584_v28, %v2221_v60 }
 0x24d   : > { %v2252_v2 = vadd.f32 %v2585_v32, %v2237_v61 }
 0x24e   : > { %2874 = vmatprep.mubr.msk.f32.mxu0 %vm708_vm1, %v2257_v62  ;;  %v2251_v3 = vadd.f32 %v2585_v32, %v2236_v63  ;;  %v2224_v4 = vld [vmem:[#allocation5 + $0x38] sm:$0xff] }
 0x24f   : > { %2875 = vmatmul.mubr.msk.f32.gmra.mrb[42].mxu0 %vm708_vm1, %v2258_v0  ;;  %v2223_v6 = vld [vmem:[#allocation5 + $0x30] sm:$0xff]  ;;  %v2239_v1 = vmul.f32 %v2584_v28, %v2224_v4  ;;  %v2260_v5 = vmax.f32 %v2252_v2, 0.0 }
 0x250   : > { %v2259_v7 = vmax.f32 %v2251_v3, 0.0  ;;  %v2238_v8 = vmul.f32 %v2584_v28, %v2223_v6 }
 0x251   : > { %v2254_v9 = vadd.f32 %v2585_v32, %v2239_v1 }
 0x252   : > { %2877 = vmatprep.mubr.msk.f32.mxu0 %vm708_vm1, %v2259_v7  ;;  %v2253_v10 = vadd.f32 %v2585_v32, %v2238_v8 }
 0x253   : > { %2878 = vmatmul.mubr.msk.f32.gmra.mrb[44].mxu0 %vm708_vm1, %v2260_v5  ;;  %v2262_v12 = vmax.f32 %v2254_v9, 0.0 }
 0x254   : > { %v2261_v11 = vmax.f32 %v2253_v10, 0.0 }
 0x256   : > { %2880 = vmatprep.mubr.msk.f32.mxu0 %vm708_vm1, %v2261_v11 }
 0x257   : > { %2881 = vmatmul.mubr.msk.f32.gmra.mrb[46].mxu0 %vm708_vm1, %v2262_v12 }
 0x31e   : > { %v2873_v14 = vpop.f32.mrb[40].mxu0 }
 0x31f   : > { %v2360_v15 = vadd.f32 %v2873_v14, %v3198_v47  ;;  %v2354_v16 = vpop.f32.mrb[41].mxu0 }
 0x320   : > { %v2355_v13 = vadd.f32 %v2354_v16, %v3200_v48 }
 0x321   : > { %2394 = vst [vmem:[%s379_s25 + $0x8] sm:$0xff] %v2360_v15 }
 0x322   : > { %2393 = vst [vmem:[%s379_s25] sm:$0xff] %v2355_v13  ;;  %v2876_v18 = vpop.f32.mrb[42].mxu0 }
 0x323   : > { %v2370_v17 = vadd.f32 %v2876_v18, %v3202_v49  ;;  %v2364_v19 = vpop.f32.mrb[43].mxu0 }
 0x324   : > { %v2365_v20 = vadd.f32 %v2364_v19, %v3204_v50 }
 0x325   : > { %2396 = vst [vmem:[%s379_s25 + $0x18] sm:$0xff] %v2370_v17 }
 0x326   : > { %2395 = vst [vmem:[%s379_s25 + $0x10] sm:$0xff] %v2365_v20  ;;  %v2879_v22 = vpop.f32.mrb[44].mxu0 }
 0x327   : > { %v2380_v23 = vadd.f32 %v2879_v22, %v3206_v51  ;;  %v2374_v47 = vpop.f32.mrb[45].mxu0 }
 0x328   : > { %v2375_v21 = vadd.f32 %v2374_v47, %v3208_v52 }
 0x329   : > { %2398 = vst [vmem:[%s379_s25 + $0x28] sm:$0xff] %v2380_v23 }
 0x32a   : > { %2397 = vst [vmem:[%s379_s25 + $0x20] sm:$0xff] %v2375_v21  ;;  %v2882_v48 = vpop.f32.mrb[46].mxu0 }
 0x32b   : > { %v2390_v49 = vadd.f32 %v2882_v48, %v3210_v53  ;;  %v2384_v24 = vpop.f32.mrb[47].mxu0 }
 0x32c   : > { %v2385_v50 = vadd.f32 %v2384_v24, %v3212_v54 }
 0x32d   : > { %2400 = vst [vmem:[%s379_s25 + $0x38] sm:$0xff] %v2390_v49 }
 0x32e   : > { %2399 = vst [vmem:[%s379_s25 + $0x30] sm:$0xff] %v2385_v50 }
 0x32f   : > { %2954 = shalt.err (!%p2951_p3)
}
 0x330   : > { %s2955_s22 = scalar_lea.hbm %s3515_s14, 1024  ;;  %s2959_s29 = scalar_lea.hbm %s3574_s11, 2048 }
 0x331   : > { %p2956_p4 = scmp.ne.s32.totalorder %s3515_s14, %s2955_s22  ;;  %p2960_p9 = scmp.lt.u32.totalorder %s3515_s14, %s3574_s11 }
 0x332   : > { %p2961_p10 = scmp.lt.u32.totalorder %s2959_s29, %s2955_s22  ;;  %p2963_p12 = scmp.lt.u32.totalorder %s2955_s22, %s3515_s14 }
 0x333   : > { %p2957_p7 = pnand %p2956_p4, %p3107_p5 }
 0x334   : > { %p2962_p11 = por %p2961_p10, %p2960_p9 }
 0x335   : > { %p2958_p8 = pneg %p2957_p7 }
 0x336   : > { %p2964_p13 = por %p2963_p12, %p2962_p11 }
 0x338   : > { %p2965_p0 = pnand %p2964_p13, %p2958_p8 }
 0x33a   : > { %2968 = shalt.err (!%p2965_p0)
}
 0x33b   : > { %s3007_s9 = smov 128   ;;  %s3008_s26 = smov 8  }
 0x33c   : > { %2899 = dma.vmem_to_hbm [thread:$0]  (%p3107_p5), %s3517_s30, 1024, %s3515_s14, %s3522_s21, %s3007_s9, %s3007_s9, %s3008_s26  }
 0x33d PF: > { %p2905_p1 = scmp.ge.s32.totalorder %s3003_s20, 2  ;;  %s2430_s15 = sand.u32 1, %s2991_s17  }
 0x33e   : > { %s2431_s16 = scalar_lea.sflag [#allocation7], %s2430_s15 }
 0x33f   : > { %p2902_p2 = pnand %p2905_p1, %p3111_p6 }
 0x341   : > { %2986 = dma.done.wait (!%p2902_p2), %s2431_s16, 1024  }
 0x342   : > { %2988 = vsyncadd (!%p2902_p2), %s2431_s16, 4294966272  ;;  %s3580_s22 = sld [smem:[#allocation9_spill]]  ;;  %p21_p3 = scmp.ge.s32.totalorder %s3094_s23, 4  }
 0x343   : > { %s3581_s17 = smov %s2995_s18  ;;  %s3582_s18 = smov %s2999_s19 }
 0x344   : > { %s3584_s20 = smov %s3094_s23  ;;  %23 = sbr.rel (!%p21_p3) target bundleno = 5 (0x5), region = 116 }
 0x348   : > { %s3583_s19 = smov %s3580_s22 }
 0x34b   :  { %2436 = vsyncpa [#allocation7], 1 }
 0x34c   :  { %2438 = vsyncpa [#allocation7 + $0x1], 1 }

</bundles_post_ra>
